<compile_context>
chip_gen: v7x
topology: tpu7x:2x2x1
jax: 0.10.0
libtpu: 0.0.40
codegen_flags: <defaults>
</compile_context>

<pallas_src>
import functools

import jax
import jax.numpy as jnp
from jax.experimental import pallas as pl
from jax.experimental.pallas import tpu as pltpu

LANES = 128


def _round_up(n, m):
    return ((n + m - 1) // m) * m


def _pick_strip_rows(hout, wout):
    """Largest divisor of Hout giving ~128 matmul rows per strip."""
    target = max(1, min(hout, -(-128 // max(wout, 1))))
    th = 1
    for cand in range(1, target + 1):
        if hout % cand == 0:
            th = cand
    return th


def _block_kernel(x_ref, dw_ref, b1_ref, pw_ref, b2_ref, o_ref, xp_ref, *,
                  H, W, stride, TH, Wout):
    """Grid = (batch, row_strip).

    x_ref : (1, H, W, Cpad_in)     input image (channels zero-padded), resident
    dw_ref: (3, 3, Cpad_in)        depthwise weights, BN1 scale pre-folded
    b1_ref: (1, Cpad_in)           BN1 folded bias (zero on padded lanes)
    pw_ref: (Cpad_in, Cpad_out)    pointwise weights (bf16), BN2 scale folded
    b2_ref: (1, Cpad_out)          BN2 folded bias (zero on padded lanes)
    o_ref : (1, TH*Wout, Cpad_out) flat lane-dense output strip
    xp_ref: (H+2, W+2, Cpad_in)    VMEM scratch holding the zero-halo image
    """
    s = pl.program_id(1)

    # Build the zero-halo padded image once per batch element (first strip).
    @pl.when(s == 0)
    def _():
        xp_ref[...] = jnp.zeros_like(xp_ref)
        xp_ref[1:H + 1, 1:W + 1, :] = x_ref[0].astype(jnp.float32)

    cpad_in = xp_ref.shape[-1]
    row0 = pl.multiple_of(s * (TH * stride), TH * stride)

    # Depthwise 3x3 conv: 9 shifted taps x per-channel weight on the VPU
    # (BN1 scale is already folded into dw_ref, so no extra multiply here).
    acc = jnp.zeros((TH, Wout, cpad_in), jnp.float32)
    for dy in range(3):
        for dx in range(3):
            if stride == 1:
                patch = xp_ref[pl.ds(row0 + dy, TH), pl.ds(dx, Wout), :]
            else:
                patch = xp_ref[pl.ds(row0 + dy, TH, stride),
                               pl.ds(dx, Wout, stride), :]
            acc = acc + patch * dw_ref[dy:dy + 1, dx:dx + 1, :]

    # BN1 (folded bias) + ReLU.  Padded lanes: 0*w + 0 -> relu(0) = 0.
    h = jnp.maximum(acc + b1_ref[...], 0.0)

    # Pointwise 1x1 conv == (TH*Wout, Cin) @ (Cin, Cout) on the MXU, bf16 feed,
    # f32 accumulation.  With Wout % 8 == 0 the reshape is a free re-tiling.
    h2 = h.reshape(TH * Wout, cpad_in).astype(jnp.bfloat16)
    y = jnp.dot(h2, pw_ref[...], preferred_element_type=jnp.float32)

    # BN2 (folded bias) + ReLU, lane-dense store of the flat strip.
    o_ref[0] = jnp.maximum(y + b2_ref[...], 0.0).astype(o_ref.dtype)


def mobilenet_block(x_nchw, params, *, stride):
    """Forward pass of the PyTorch Block (inference-mode BN)."""
    B, Cin, H, W = x_nchw.shape
    cpad_in = params["dw_w"].shape[-1]
    cpad_out = params["pw_w"].shape[-1]
    cout = int(params["out_channels"])

    Hout = (H - 1) // stride + 1
    Wout = (W - 1) // stride + 1
    TH = _pick_strip_rows(Hout, Wout)
    n_strips = Hout // TH

    # NCHW -> NHWC; zero-pad channels to a multiple of 128 (lane-dense).
    # (The channel pad fuses with the unavoidable layout transpose in XLA.)
    x = jnp.transpose(x_nchw, (0, 2, 3, 1))
    if cpad_in != Cin:
        x = jnp.pad(x, ((0, 0), (0, 0), (0, 0), (0, cpad_in - Cin)))

    kernel = functools.partial(_block_kernel, H=H, W=W, stride=stride,
                               TH=TH, Wout=Wout)

    itemsize = x.dtype.itemsize
    flops = B * Hout * Wout * (9 * 2 * cpad_in + 2 * cpad_in * cpad_out)
    bytes_accessed = (x.size * itemsize
                      + B * Hout * Wout * cpad_out * itemsize
                      + params["dw_w"].size * params["dw_w"].dtype.itemsize
                      + params["pw_w"].size * params["pw_w"].dtype.itemsize
                      + (cpad_in + cpad_out) * 4)

    out_flat = pl.pallas_call(
        kernel,
        out_shape=jax.ShapeDtypeStruct((B, Hout * Wout, cpad_out), x.dtype),
        grid_spec=pltpu.PrefetchScalarGridSpec(
            num_scalar_prefetch=0,
            grid=(B, n_strips),
            in_specs=[
                # Full image resident across strips (block index ignores s).
                pl.BlockSpec((1, H, W, cpad_in), lambda b, s: (b, 0, 0, 0)),
                pl.BlockSpec((3, 3, cpad_in), lambda b, s: (0, 0, 0)),
                pl.BlockSpec((1, cpad_in), lambda b, s: (0, 0)),
                pl.BlockSpec((cpad_in, cpad_out), lambda b, s: (0, 0)),
                pl.BlockSpec((1, cpad_out), lambda b, s: (0, 0)),
            ],
            out_specs=pl.BlockSpec((1, TH * Wout, cpad_out),
                                   lambda b, s: (b, s, 0)),
            scratch_shapes=[pltpu.VMEM((H + 2, W + 2, cpad_in), jnp.float32)],
        ),
        compiler_params=pltpu.CompilerParams(
            dimension_semantics=("parallel", "arbitrary"),
            vmem_limit_bytes=32 * 1024 * 1024),
        cost_estimate=pl.CostEstimate(flops=flops, transcendentals=0,
                                      bytes_accessed=bytes_accessed),
    )(x, params["dw_w"], params["bias1"], params["pw_w"], params["bias2"])

    # Free metadata reshape on HBM, drop padded channels, back to NCHW.
    out = out_flat.reshape(B, Hout, Wout, cpad_out)[..., :cout]
    return jnp.transpose(out, (0, 3, 1, 2))


def make_raw_params(key, in_C, out_C):
    """Raw PyTorch-layout weights + BatchNorm running stats."""
    ks = jax.random.split(key, 10)
    return {
        "dw_w": 0.3 * jax.random.normal(ks[0], (in_C, 1, 3, 3), jnp.float32),
        "pw_w": 0.3 * jax.random.normal(ks[1], (out_C, in_C, 1, 1), jnp.float32),
        "gamma1": 1.0 + 0.1 * jax.random.normal(ks[2], (in_C,), jnp.float32),
        "beta1": 0.1 * jax.random.normal(ks[3], (in_C,), jnp.float32),
        "mean1": 0.1 * jax.random.normal(ks[4], (in_C,), jnp.float32),
        "var1": jnp.abs(jax.random.normal(ks[5], (in_C,), jnp.float32)) + 0.5,
        "gamma2": 1.0 + 0.1 * jax.random.normal(ks[6], (out_C,), jnp.float32),
        "beta2": 0.1 * jax.random.normal(ks[7], (out_C,), jnp.float32),
        "mean2": 0.1 * jax.random.normal(ks[8], (out_C,), jnp.float32),
        "var2": jnp.abs(jax.random.normal(ks[9], (out_C,), jnp.float32)) + 0.5,
    }


def fold_and_pad_params(raw, eps=1e-5):
    """Fold inference-mode BN into the conv weights; pad channels to 128."""
    in_C = raw["dw_w"].shape[0]
    out_C = raw["pw_w"].shape[0]
    cpad_in = _round_up(in_C, LANES)
    cpad_out = _round_up(out_C, LANES)

    scale1 = raw["gamma1"] / jnp.sqrt(raw["var1"] + eps)
    bias1 = raw["beta1"] - raw["mean1"] * scale1
    scale2 = raw["gamma2"] / jnp.sqrt(raw["var2"] + eps)
    bias2 = raw["beta2"] - raw["mean2"] * scale2

    dw = jnp.transpose(raw["dw_w"][:, 0], (1, 2, 0)) * scale1          # (3,3,Cin)
    pw = jnp.transpose(raw["pw_w"][:, :, 0, 0], (1, 0)) * scale2       # (Cin,Cout)

    # Padded lanes get zero weights AND zero biases -> they stay exactly 0.
    dw = jnp.pad(dw, ((0, 0), (0, 0), (0, cpad_in - in_C)))
    pw = jnp.pad(pw, ((0, cpad_in - in_C), (0, cpad_out - out_C)))
    bias1 = jnp.pad(bias1, (0, cpad_in - in_C)).reshape(1, cpad_in)
    bias2 = jnp.pad(bias2, (0, cpad_out - out_C)).reshape(1, cpad_out)

    return {
        "dw_w": dw.astype(jnp.float32),
        "pw_w": pw.astype(jnp.bfloat16),     # bf16 MXU feed
        "bias1": bias1.astype(jnp.float32),
        "bias2": bias2.astype(jnp.float32),
        "out_channels": out_C,
    }


def reference_block(x_nchw, raw, *, stride, eps=1e-5):
    """Pure-JAX reference (lax conv, inference-mode BN).  The pointwise conv
    is fed bf16 exactly like the kernel so tolerances stay tight."""
    x = jnp.transpose(x_nchw, (0, 2, 3, 1)).astype(jnp.float32)
    cin = x.shape[-1]
    dw = jnp.transpose(raw["dw_w"][:, 0], (1, 2, 0)).reshape(3, 3, 1, cin)
    h = jax.lax.conv_general_dilated(
        x, dw, window_strides=(stride, stride), padding=((1, 1), (1, 1)),
        dimension_numbers=("NHWC", "HWIO", "NHWC"), feature_group_count=cin)
    h = (h - raw["mean1"]) / jnp.sqrt(raw["var1"] + eps) * raw["gamma1"] \
        + raw["beta1"]
    h = jnp.maximum(h, 0.0)

    scale2 = raw["gamma2"] / jnp.sqrt(raw["var2"] + eps)
    bias2 = raw["beta2"] - raw["mean2"] * scale2
    pw = jnp.transpose(raw["pw_w"][:, :, 0, 0], (1, 0)) * scale2
    y = jnp.dot(h.astype(jnp.bfloat16).reshape(-1, cin),
                pw.astype(jnp.bfloat16),
                preferred_element_type=jnp.float32)
    y = y.reshape(h.shape[:-1] + (pw.shape[1],)) + bias2
    y = jnp.maximum(y, 0.0)
    return jnp.transpose(y, (0, 3, 1, 2))


if __name__ == "__main__":
    B, in_C, out_C, H, W, stride = 2, 4, 8, 16, 16, 1

    key = jax.random.PRNGKey(0)
    kx, kp = jax.random.split(key)
    x = jax.random.normal(kx, (B, in_C, H, W), jnp.float32)

    raw = make_raw_params(kp, in_C, out_C)
    params = fold_and_pad_params(raw)

    y = jax.block_until_ready(mobilenet_block(x, params, stride=stride))
    y_ref = reference_block(x, raw, stride=stride)

    Hout = (H - 1) // stride + 1
    Wout = (W - 1) // stride + 1
    assert y.shape == (B, out_C, Hout, Wout), y.shape
    max_err = float(jnp.max(jnp.abs(y - y_ref)))
    assert jnp.allclose(y, y_ref, atol=2e-2, rtol=2e-2), max_err

    print("KERNEL_OK")
</pallas_src>

<mosaic_0001>
module attributes {stable_mosaic.version = 11 : i64} {
  func.func @_block_kernel(%arg0: i32, %arg1: i32, %arg2: memref<1x16x16x128xf32, #tpu.memory_space<vmem>>, %arg3: memref<3x3x128xf32, #tpu.memory_space<vmem>>, %arg4: memref<1x128xf32, #tpu.memory_space<vmem>>, %arg5: memref<128x128xbf16, #tpu.memory_space<vmem>>, %arg6: memref<1x128xf32, #tpu.memory_space<vmem>>, %arg7: memref<1x128x128xf32, #tpu.memory_space<vmem>>, %arg8: memref<18x18x128xf32, #tpu.memory_space<vmem>>) attributes {dimension_semantics = [#tpu.dimension_semantics<parallel>, #tpu.dimension_semantics<arbitrary>], iteration_bounds = array<i64: 2, 2>, scalar_prefetch = 0 : i64, scratch_operands = 1 : i64, tpu.core_type = #tpu.core_type<tc>, window_params = [{transform_indices = @transform_0, window_bounds = array<i64: 1, 16, 16, 128>}, {pipeline_mode = #tpu.pipeline_mode<synchronous>, transform_indices = @transform_1, window_bounds = array<i64: 3, 3, 128>}, {pipeline_mode = #tpu.pipeline_mode<synchronous>, transform_indices = @transform_2, window_bounds = array<i64: 1, 128>}, {pipeline_mode = #tpu.pipeline_mode<synchronous>, transform_indices = @transform_3, window_bounds = array<i64: 128, 128>}, {pipeline_mode = #tpu.pipeline_mode<synchronous>, transform_indices = @transform_4, window_bounds = array<i64: 1, 128>}, {transform_indices = @transform_5, window_bounds = array<i64: 1, 128, 128>}]} {
    %c0_i32 = arith.constant 0 : i32
    %0 = arith.cmpi eq, %arg1, %c0_i32 : i32
    %1 = arith.extui %0 : i1 to i32
    %c0_i32_0 = arith.constant 0 : i32
    %2 = arith.cmpi ne, %1, %c0_i32_0 : i32
    scf.if %2 {
      %cst_62 = arith.constant 0.000000e+00 : f32
      %87 = vector.broadcast %cst_62 : f32 to vector<18x18x128xf32>
      %c0_63 = arith.constant 0 : index
      %c0_64 = arith.constant 0 : index
      %c0_65 = arith.constant 0 : index
      %88 = vector.load %arg8[%c0_63, %c0_64, %c0_65] : memref<18x18x128xf32, #tpu.memory_space<vmem>>, vector<18x18x128xf32>
      tpu.vector_store %arg8[%c0_63, %c0_64, %c0_65], %87 {strides = array<i32>} : memref<18x18x128xf32, #tpu.memory_space<vmem>>, vector<18x18x128xf32>,
      %c0_66 = arith.constant 0 : index
      %c0_67 = arith.constant 0 : index
      %c0_68 = arith.constant 0 : index
      %c0_69 = arith.constant 0 : index
      %89 = vector.load %arg2[%c0_66, %c0_67, %c0_68, %c0_69] : memref<1x16x16x128xf32, #tpu.memory_space<vmem>>, vector<1x16x16x128xf32>
      %90 = vector.shape_cast %89 : vector<1x16x16x128xf32> to vector<16x16x128xf32>
      %c1_70 = arith.constant 1 : index
      %c1_71 = arith.constant 1 : index
      %c0_72 = arith.constant 0 : index
      %91 = vector.load %arg8[%c1_70, %c1_71, %c0_72] : memref<18x18x128xf32, #tpu.memory_space<vmem>>, vector<16x16x128xf32>
      tpu.vector_store %arg8[%c1_70, %c1_71, %c0_72], %90 {strides = array<i32>} : memref<18x18x128xf32, #tpu.memory_space<vmem>>, vector<16x16x128xf32>,
    } else {
    }
    %c8_i32 = arith.constant 8 : i32
    %3 = arith.muli %arg1, %c8_i32 : i32
    %4 = tpu.assume_multiple %3, 8 : i32
    %cst = arith.constant 0.000000e+00 : f32
    %5 = vector.broadcast %cst : f32 to vector<8x16x128xf32>
    %c0_i32_1 = arith.constant 0 : i32
    %6 = arith.addi %4, %c0_i32_1 : i32
    %7 = arith.index_cast %6 : i32 to index
    %c0 = arith.constant 0 : index
    %c0_2 = arith.constant 0 : index
    %8 = vector.load %arg8[%7, %c0, %c0_2] : memref<18x18x128xf32, #tpu.memory_space<vmem>>, vector<8x16x128xf32>
    %c0_3 = arith.constant 0 : index
    %c0_4 = arith.constant 0 : index
    %c0_5 = arith.constant 0 : index
    %9 = vector.load %arg3[%c0_3, %c0_4, %c0_5] : memref<3x3x128xf32, #tpu.memory_space<vmem>>, vector<1x1x128xf32>
    %10 = vector.broadcast %9 : vector<1x1x128xf32> to vector<8x16x128xf32>
    %11 = arith.mulf %8, %10 : vector<8x16x128xf32>
    %12 = arith.addf %5, %11 : vector<8x16x128xf32>
    %c0_i32_6 = arith.constant 0 : i32
    %13 = arith.addi %4, %c0_i32_6 : i32
    %14 = arith.index_cast %13 : i32 to index
    %c1 = arith.constant 1 : index
    %c0_7 = arith.constant 0 : index
    %15 = vector.load %arg8[%14, %c1, %c0_7] : memref<18x18x128xf32, #tpu.memory_space<vmem>>, vector<8x16x128xf32>
    %c0_8 = arith.constant 0 : index
    %c1_9 = arith.constant 1 : index
    %c0_10 = arith.constant 0 : index
    %16 = vector.load %arg3[%c0_8, %c1_9, %c0_10] : memref<3x3x128xf32, #tpu.memory_space<vmem>>, vector<1x1x128xf32>
    %17 = vector.broadcast %16 : vector<1x1x128xf32> to vector<8x16x128xf32>
    %18 = arith.mulf %15, %17 : vector<8x16x128xf32>
    %19 = arith.addf %12, %18 : vector<8x16x128xf32>
    %c0_i32_11 = arith.constant 0 : i32
    %20 = arith.addi %4, %c0_i32_11 : i32
    %21 = arith.index_cast %20 : i32 to index
    %c2 = arith.constant 2 : index
    %c0_12 = arith.constant 0 : index
    %22 = vector.load %arg8[%21, %c2, %c0_12] : memref<18x18x128xf32, #tpu.memory_space<vmem>>, vector<8x16x128xf32>
    %c0_13 = arith.constant 0 : index
    %c2_14 = arith.constant 2 : index
    %c0_15 = arith.constant 0 : index
    %23 = vector.load %arg3[%c0_13, %c2_14, %c0_15] : memref<3x3x128xf32, #tpu.memory_space<vmem>>, vector<1x1x128xf32>
    %24 = vector.broadcast %23 : vector<1x1x128xf32> to vector<8x16x128xf32>
    %25 = arith.mulf %22, %24 : vector<8x16x128xf32>
    %26 = arith.addf %19, %25 : vector<8x16x128xf32>
    %c1_i32 = arith.constant 1 : i32
    %27 = arith.addi %4, %c1_i32 : i32
    %28 = arith.index_cast %27 : i32 to index
    %c0_16 = arith.constant 0 : index
    %c0_17 = arith.constant 0 : index
    %29 = vector.load %arg8[%28, %c0_16, %c0_17] : memref<18x18x128xf32, #tpu.memory_space<vmem>>, vector<8x16x128xf32>
    %c1_18 = arith.constant 1 : index
    %c0_19 = arith.constant 0 : index
    %c0_20 = arith.constant 0 : index
    %30 = vector.load %arg3[%c1_18, %c0_19, %c0_20] : memref<3x3x128xf32, #tpu.memory_space<vmem>>, vector<1x1x128xf32>
    %31 = vector.broadcast %30 : vector<1x1x128xf32> to vector<8x16x128xf32>
    %32 = arith.mulf %29, %31 : vector<8x16x128xf32>
    %33 = arith.addf %26, %32 : vector<8x16x128xf32>
    %c1_i32_21 = arith.constant 1 : i32
    %34 = arith.addi %4, %c1_i32_21 : i32
    %35 = arith.index_cast %34 : i32 to index
    %c1_22 = arith.constant 1 : index
    %c0_23 = arith.constant 0 : index
    %36 = vector.load %arg8[%35, %c1_22, %c0_23] : memref<18x18x128xf32, #tpu.memory_space<vmem>>, vector<8x16x128xf32>
    %c1_24 = arith.constant 1 : index
    %c1_25 = arith.constant 1 : index
    %c0_26 = arith.constant 0 : index
    %37 = vector.load %arg3[%c1_24, %c1_25, %c0_26] : memref<3x3x128xf32, #tpu.memory_space<vmem>>, vector<1x1x128xf32>
    %38 = vector.broadcast %37 : vector<1x1x128xf32> to vector<8x16x128xf32>
    %39 = arith.mulf %36, %38 : vector<8x16x128xf32>
    %40 = arith.addf %33, %39 : vector<8x16x128xf32>
    %c1_i32_27 = arith.constant 1 : i32
    %41 = arith.addi %4, %c1_i32_27 : i32
    %42 = arith.index_cast %41 : i32 to index
    %c2_28 = arith.constant 2 : index
    %c0_29 = arith.constant 0 : index
    %43 = vector.load %arg8[%42, %c2_28, %c0_29] : memref<18x18x128xf32, #tpu.memory_space<vmem>>, vector<8x16x128xf32>
    %c1_30 = arith.constant 1 : index
    %c2_31 = arith.constant 2 : index
    %c0_32 = arith.constant 0 : index
    %44 = vector.load %arg3[%c1_30, %c2_31, %c0_32] : memref<3x3x128xf32, #tpu.memory_space<vmem>>, vector<1x1x128xf32>
    %45 = vector.broadcast %44 : vector<1x1x128xf32> to vector<8x16x128xf32>
    %46 = arith.mulf %43, %45 : vector<8x16x128xf32>
    %47 = arith.addf %40, %46 : vector<8x16x128xf32>
    %c2_i32 = arith.constant 2 : i32
    %48 = arith.addi %4, %c2_i32 : i32
    %49 = arith.index_cast %48 : i32 to index
    %c0_33 = arith.constant 0 : index
    %c0_34 = arith.constant 0 : index
    %50 = vector.load %arg8[%49, %c0_33, %c0_34] : memref<18x18x128xf32, #tpu.memory_space<vmem>>, vector<8x16x128xf32>
    %c2_35 = arith.constant 2 : index
    %c0_36 = arith.constant 0 : index
    %c0_37 = arith.constant 0 : index
    %51 = vector.load %arg3[%c2_35, %c0_36, %c0_37] : memref<3x3x128xf32, #tpu.memory_space<vmem>>, vector<1x1x128xf32>
    %52 = vector.broadcast %51 : vector<1x1x128xf32> to vector<8x16x128xf32>
    %53 = arith.mulf %50, %52 : vector<8x16x128xf32>
    %54 = arith.addf %47, %53 : vector<8x16x128xf32>
    %c2_i32_38 = arith.constant 2 : i32
    %55 = arith.addi %4, %c2_i32_38 : i32
    %56 = arith.index_cast %55 : i32 to index
    %c1_39 = arith.constant 1 : index
    %c0_40 = arith.constant 0 : index
    %57 = vector.load %arg8[%56, %c1_39, %c0_40] : memref<18x18x128xf32, #tpu.memory_space<vmem>>, vector<8x16x128xf32>
    %c2_41 = arith.constant 2 : index
    %c1_42 = arith.constant 1 : index
    %c0_43 = arith.constant 0 : index
    %58 = vector.load %arg3[%c2_41, %c1_42, %c0_43] : memref<3x3x128xf32, #tpu.memory_space<vmem>>, vector<1x1x128xf32>
    %59 = vector.broadcast %58 : vector<1x1x128xf32> to vector<8x16x128xf32>
    %60 = arith.mulf %57, %59 : vector<8x16x128xf32>
    %61 = arith.addf %54, %60 : vector<8x16x128xf32>
    %c2_i32_44 = arith.constant 2 : i32
    %62 = arith.addi %4, %c2_i32_44 : i32
    %63 = arith.index_cast %62 : i32 to index
    %c2_45 = arith.constant 2 : index
    %c0_46 = arith.constant 0 : index
    %64 = vector.load %arg8[%63, %c2_45, %c0_46] : memref<18x18x128xf32, #tpu.memory_space<vmem>>, vector<8x16x128xf32>
    %c2_47 = arith.constant 2 : index
    %c2_48 = arith.constant 2 : index
    %c0_49 = arith.constant 0 : index
    %65 = vector.load %arg3[%c2_47, %c2_48, %c0_49] : memref<3x3x128xf32, #tpu.memory_space<vmem>>, vector<1x1x128xf32>
    %66 = vector.broadcast %65 : vector<1x1x128xf32> to vector<8x16x128xf32>
    %67 = arith.mulf %64, %66 : vector<8x16x128xf32>
    %68 = arith.addf %61, %67 : vector<8x16x128xf32>
    %c0_50 = arith.constant 0 : index
    %c0_51 = arith.constant 0 : index
    %69 = vector.load %arg4[%c0_50, %c0_51] : memref<1x128xf32, #tpu.memory_space<vmem>>, vector<1x128xf32>
    %70 = vector.shape_cast %69 : vector<1x128xf32> to vector<1x1x128xf32>
    %71 = vector.broadcast %70 : vector<1x1x128xf32> to vector<8x16x128xf32>
    %72 = arith.addf %68, %71 : vector<8x16x128xf32>
    %cst_52 = arith.constant 0.000000e+00 : f32
    %73 = vector.broadcast %cst_52 : f32 to vector<8x16x128xf32>
    %74 = arith.maximumf %72, %73 : vector<8x16x128xf32>
    %75 = vector.shape_cast %74 : vector<8x16x128xf32> to vector<128x128xf32>
    %76 = arith.truncf %75 : vector<128x128xf32> to vector<128x128xbf16>
    %c0_53 = arith.constant 0 : index
    %c0_54 = arith.constant 0 : index
    %77 = vector.load %arg5[%c0_53, %c0_54] : memref<128x128xbf16, #tpu.memory_space<vmem>>, vector<128x128xbf16>
    %cst_55 = arith.constant dense<0.000000e+00> : vector<128x128xf32>
    %78 = tpu.matmul %76, %77, %cst_55 {dimension_numbers = #tpu.dot_dimension_numbers<[1], [0], [0], [1], [0, 0, 1, 1], [], []>} : vector<128x128xbf16>, vector<128x128xbf16>, vector<128x128xf32> -> vector<128x128xf32>
    %c0_56 = arith.constant 0 : index
    %c0_57 = arith.constant 0 : index
    %79 = vector.load %arg6[%c0_56, %c0_57] : memref<1x128xf32, #tpu.memory_space<vmem>>, vector<1x128xf32>
    %80 = vector.broadcast %79 : vector<1x128xf32> to vector<128x128xf32>
    %81 = arith.addf %78, %80 : vector<128x128xf32>
    %cst_58 = arith.constant 0.000000e+00 : f32
    %82 = vector.broadcast %cst_58 : f32 to vector<128x128xf32>
    %83 = arith.maximumf %81, %82 : vector<128x128xf32>
    %c0_59 = arith.constant 0 : index
    %c0_60 = arith.constant 0 : index
    %c0_61 = arith.constant 0 : index
    %84 = vector.load %arg7[%c0_59, %c0_60, %c0_61] : memref<1x128x128xf32, #tpu.memory_space<vmem>>, vector<1x128x128xf32>
    %85 = vector.shape_cast %84 : vector<1x128x128xf32> to vector<128x128xf32>
    %86 = vector.shape_cast %83 : vector<128x128xf32> to vector<1x128x128xf32>
    tpu.vector_store %arg7[%c0_59, %c0_60, %c0_61], %86 {strides = array<i32>} : memref<1x128x128xf32, #tpu.memory_space<vmem>>, vector<1x128x128xf32>,
    return
  }
  func.func @transform_0(%arg0: i32, %arg1: i32) -> (i32, i32, i32, i32) {
    %c0_i32 = arith.constant 0 : i32
    %c0_i32_0 = arith.constant 0 : i32
    %c0_i32_1 = arith.constant 0 : i32
    %c0_i32_2 = arith.constant 0 : i32
    return %arg0, %c0_i32, %c0_i32_0, %c0_i32_1 : i32, i32, i32, i32
  }
  func.func @transform_1(%arg0: i32, %arg1: i32) -> (i32, i32, i32) {
    %c0_i32 = arith.constant 0 : i32
    %c0_i32_0 = arith.constant 0 : i32
    %c0_i32_1 = arith.constant 0 : i32
    %c0_i32_2 = arith.constant 0 : i32
    return %c0_i32, %c0_i32_0, %c0_i32_1 : i32, i32, i32
  }
  func.func @transform_2(%arg0: i32, %arg1: i32) -> (i32, i32) {
    %c0_i32 = arith.constant 0 : i32
    %c0_i32_0 = arith.constant 0 : i32
    %c0_i32_1 = arith.constant 0 : i32
    return %c0_i32, %c0_i32_0 : i32, i32
  }
  func.func @transform_3(%arg0: i32, %arg1: i32) -> (i32, i32) {
    %c0_i32 = arith.constant 0 : i32
    %c0_i32_0 = arith.constant 0 : i32
    %c0_i32_1 = arith.constant 0 : i32
    return %c0_i32, %c0_i32_0 : i32, i32
  }
  func.func @transform_4(%arg0: i32, %arg1: i32) -> (i32, i32) {
    %c0_i32 = arith.constant 0 : i32
    %c0_i32_0 = arith.constant 0 : i32
    %c0_i32_1 = arith.constant 0 : i32
    return %c0_i32, %c0_i32_0 : i32, i32
  }
  func.func @transform_5(%arg0: i32, %arg1: i32) -> (i32, i32, i32) {
    %c0_i32 = arith.constant 0 : i32
    %c0_i32_0 = arith.constant 0 : i32
    return %arg0, %arg1, %c0_i32 : i32, i32, i32
  }
}

</mosaic_0001>

<bundles_post_ra>
// kernel: tpu_custom_call.1
= control target key start
LH: loop header
LB: loop body
LE: loop exit
PB: predicated region body
PF: predicated region fallthrough
CT: control target
= control target key end

     0   :  { %s2731_s0 = inlined_call_operand.hbm [shape: f32[2,16,16,128], index: 0, kind: input, shape index: {}]   ;;  %s2732_s1 = inlined_call_operand.hbm [shape: f32[3,3,128], index: 1, kind: input, shape index: {}]   ;;  %s2733_s2 = inlined_call_operand.vmem [shape: f32[1,128], index: 2, kind: input, shape index: {}]   ;;  %s2734_s3 = inlined_call_operand.hbm [shape: bf16[128,128], index: 3, kind: input, shape index: {}]   ;;  %s2735_s4 = inlined_call_operand.vmem [shape: f32[1,128], index: 4, kind: input, shape index: {}]   ;;  %s2736_s5 = inlined_call_operand.hbm [shape: f32[2,256,128], index: 5, kind: output, shape index: {}]  }
   0x1   :  { %2755 = sst [smem:[#allocation24_spill]] %s2732_s1 }
   0x2   :  { %2756 = sst [smem:[#allocation25_spill]] %s2734_s3 }
   0x3   :  { %2757 = sst [smem:[#allocation26_spill]] %s2736_s5 }
   0x4   :  { %10 = vsyncpa [#allocation4], 0 }
   0x5   :  { %12 = vsyncpa [#allocation4 + $0x1], 0 }
   0x6   :  { %13 = vsyncpa [#allocation7], 0 }
   0x7   :  { %14 = vsyncpa [#allocation5], 0 }
   0x8   :  { %16 = vsyncpa [#allocation5 + $0x1], 0  ;;  %s1878_s18 = smov 0   ;;  %s1880_s19 = smov 0  }
   0x9   :  { %s1882_s20 = smov 0   ;;  %s1884_s21 = smov 0  }
   0xa   :  { %s1886_s22 = smov 0   ;;  %s1888_s23 = smov 0  }
   0xb   :  { %s1890_s24 = smov 0   ;;  %s1892_s25 = smov 0  }
   0xc   :  { %s1894_s26 = smov 0   ;;  %s1896_s27 = smov 0  }
   0xd   :  { %s1898_s28 = smov 0  }
   0xe LB: > { %2758 = sst [smem:[#allocation13_spill]] %s1795_s18  ;;  %s1278_s29 = sadd.s32 4294967295, %s1835_s28   ;;  %s1835_s28 = sphi %s1898_s28, %s22_s28   ;;  %s1831_s27 = sphi %s1896_s27, %s2807_s27   ;;  %s1827_s26 = sphi %s1894_s26, %s2798_s26   ;;  %s1823_s25 = sphi %s1892_s25, %s2806_s25   ;;  %s1819_s24 = sphi %s1890_s24, %s2805_s24   ;;  %s1815_s23 = sphi %s1888_s23, %s2804_s23   ;;  %s1811_s22 = sphi %s1886_s22, %s2803_s22   ;;  %s1807_s21 = sphi %s1884_s21, %s2802_s21   ;;  %s1803_s20 = sphi %s1882_s20, %s2801_s20   ;;  %s1799_s19 = sphi %s1880_s19, %s2800_s19   ;;  %s1795_s18 = sphi %s1878_s18, %s2799_s18  }
   0xf   : > { %2759 = sst [smem:[#allocation14_spill]] %s1827_s26  ;;  %s1279_s30 = sadd.s32 4294967294, %s1835_s28  }
  0x10   : > { %p54_p0 = scmp.ne.s32.totalorder %s1811_s22, %s1807_s21  ;;  %p1934_p1 = scmp.eq.s32.totalorder %s1278_s29, 0 }
  0x11   : > { %p163_p2 = scmp.ne.s32.totalorder %s1803_s20, %s1799_s19  ;;  %p164_p4 = scmp.eq.s32.totalorder %s1278_s29, 3 }
  0x12   : > { %s2760_s6 = scalar_select %p1934_p1, 1, 0 }
  0x13   : > { %p1943_p3 = por %p1934_p1, %p54_p0  ;;  %p169_p5 = scmp.ne.s32.totalorder %s1799_s19, %s1795_s18 }
  0x14   : > { %p170_p6 = scmp.eq.s32.totalorder %s1279_s30, 3  ;;  %p1949_p7 = por %p164_p4, %p163_p2 }
  0x15   : > { %s2761_s8 = scalar_select %p1943_p3, 1, 0 }
  0x16   : > { %s2762_s9 = scalar_select %p1949_p7, 1, 0 }
  0x17   : > { %p1280_p8 = scmp.ge.s32.totalorder %s1835_s28, 1  ;;  %p1954_p9 = por %p170_p6, %p169_p5 }
  0x18   : > { %2763 = sst [smem:[#allocation15_spill]] %s2762_s9  ;;  %p177_p10 = scmp.lt.s32.totalorder %s1835_s28, 5 }
  0x19   : > { %s2764_s10 = scalar_select %p1954_p9, 1, 0 }
  0x1a   : > { %p1959_p11 = pnand %p1280_p8, %p177_p10  ;;  %s1837_s12 = smov [#allocation6]  }
  0x1b   : > { %2765 = sst [smem:[#allocation16_spill]] %s2764_s10  ;;  %s189_s13 = sshll.u32 %s1837_s12, 4  ;;  %s190_s13 = int_to_ptr.vmem [resolvable:$true] %s189_s13 }
  0x1c   : > { %s2766_s11 = scalar_select %p1959_p11, 1, 0 }
  0x1d   : > { %p1497_p12 = pneg %p1959_p11  ;;  %s1838_s15 = smov [#allocation8]  }
  0x1e   : > { %s205_s16 = sshll.u32 %s1838_s15, 4  ;;  %s2768_s1 = sld [smem:[#allocation24_spill]]  ;;  %s1971_s16 = int_to_ptr.vmem [resolvable:$true] %s205_s16 }
  0x1f   : > { %p1967_p13 = pnand %p1497_p12, %p1934_p1 }
  0x21   : > { %p1625_p2 = pneg %p1967_p13 }
  0x24   : > { %s1623_s29 = scalar_lea.hbm %s2768_s1, 192 }
  0x25   : > { %p1624_p0 = scmp.ne.s32.totalorder %s2768_s1, %s1623_s29  ;;  %p1630_p6 = scmp.lt.u32.totalorder %s1623_s29, %s2768_s1 }
  0x27   : > { %p1626_p4 = pnand %p1625_p2, %p1624_p0 }
  0x29   : > { %p1627_p5 = pneg %p1626_p4 }
  0x2b   : > { %p1632_p8 = pnand %p1630_p6, %p1627_p5 }
  0x2d   : > { %1635 = shalt.err (!%p1632_p8)
}
  0x2e   : > { %s1636_s15 = scalar_lea.vmem %s190_s13, 192  ;;  %p1644_p7 = scmp.lt.s32.totalorder %s190_s13, %s190_s13 }
  0x2f   : > { %p1637_p10 = scmp.ne.s32.totalorder %s190_s13, %s1636_s15  ;;  %p1645_p1 = scmp.lt.s32.totalorder %s1636_s15, %s1636_s15 }
  0x31   : > { %p1639_p12 = pnand %p1637_p10, %p1625_p2  ;;  %p1646_p3 = por %p1645_p1, %p1644_p7 }
  0x33   : > { %p1640_p9 = pneg %p1639_p12 }
  0x35   : > { %p1647_p11 = pnand %p1646_p3, %p1640_p9 }
  0x37   : > { %1650 = shalt.err (!%p1647_p11)
}
  0x38   : > { %s1839_s17 = smov 64   ;;  %s1840_s21 = smov 4  }
  0x39   : > { %1500 = dma.hbm_to_vmem [thread:$0]  (!%p1967_p13), %s2768_s1, 192, %s190_s13, [#allocation7], %s1839_s17, %s1839_s17, %s1840_s21  }
  0x3a   : > { %s2769_s3 = sld [smem:[#allocation25_spill]] }
  0x40   : > { %s1651_s12 = scalar_lea.hbm %s2769_s3, 1024 }
  0x41   : > { %p1652_p0 = scmp.ne.s32.totalorder %s2769_s3, %s1651_s12  ;;  %p1658_p7 = scmp.lt.u32.totalorder %s1651_s12, %s2769_s3 }
  0x43   : > { %p1654_p1 = pnand %p1652_p0, %p1625_p2 }
  0x45   : > { %p1655_p3 = pneg %p1654_p1 }
  0x47   : > { %p1660_p9 = pnand %p1658_p7, %p1655_p3 }
  0x49   : > { %1663 = shalt.err (!%p1660_p9)
}
  0x4a   : > { %s1664_s13 = scalar_lea.vmem %s1971_s16, 1024  ;;  %p1672_p6 = scmp.lt.s32.totalorder %s1971_s16, %s1971_s16 }
  0x4b   : > { %p1665_p11 = scmp.ne.s32.totalorder %s1971_s16, %s1664_s13  ;;  %p1673_p8 = scmp.lt.s32.totalorder %s1664_s13, %s1664_s13 }
  0x4d   : > { %p1667_p4 = pnand %p1665_p11, %p1625_p2  ;;  %p1674_p10 = por %p1673_p8, %p1672_p6 }
  0x4f   : > { %p1668_p5 = pneg %p1667_p4 }
  0x51   : > { %p1675_p12 = pnand %p1674_p10, %p1668_p5 }
  0x53   : > { %1678 = shalt.err (!%p1675_p12)
}
  0x54   : > { %1503 = dma.hbm_to_vmem [thread:$0]  (!%p1967_p13), %s2769_s3, 1024, %s1971_s16, [#allocation7], %s1839_s17, %s1839_s17, %s1840_s21  }
  0x55   : > { %s31_s9 = sadd.s32 1, %s1827_s26  ;;  %s34_s7 = sadd.s32 1, %s1831_s27 }
  0x56   : > { %p32_p2 = scmp.ge.s32.totalorder %s31_s9, 2  ;;  %s41_s14 = sadd.s32 1, %s1815_s23 }
  0x57   : > { %p48_p0 = scmp.ne.s32.totalorder %s1815_s23, %s1811_s22  ;;  %p49_p1 = scmp.eq.s32.totalorder %s1835_s28, 0 }
  0x58   : > { %s2809_s9 = smov (%p32_p2, %s31_s9), 0  ;;  %s2811_s7 = smov (!%p32_p2, %s34_s7), %s1831_s27 }
  0x59   : > { %2770 = sst [smem:[#allocation17_spill]] %s2809_s9  ;;  %p2029_p3 = por %p49_p1, %p48_p0 }
  0x5a   : > { %s149_s29 = ssub.s32 %s1827_s26, %s2809_s9  ;;  %p36_p13 = scmp.ge.s32.totalorder %s2811_s7, 2 }
  0x5b   : > { %p1514_p7 = scmp.lt.s32.totalorder %s1835_s28, 4  ;;  %s222_s16 = sand.u32 1, %s1815_s23  }
  0x5c   : > { %s1420_s17 = sshll.u32 %s1831_s27, 12  ;;  %s2813_s7 = smov (%p36_p13, %s2811_s7), 0 }
  0x5d   : > { %s1284_s21 = sshll.u32 %s222_s16, 8  ;;  %s38_s30 = ssub.s32 %s1831_s27, %s2813_s7 }
  0x5e   : > { %p39_p9 = scmp.eq.s32.totalorder %s38_s30, 0  ;;  %s150_s12 = sor.u32 %s149_s29, %s38_s30 }
  0x5f   : > { %p151_p11 = scmp.eq.s32.totalorder %s150_s12, 0  ;;  %s2045_s5 = scalar_lea.hbm %s2731_s0, %s1420_s17 }
  0x60   : > { %s2048_s18 = scalar_select %p39_p9, %s1815_s23, %s41_s14  }
  0x61   : > { %s2772_s1 = sadd.s32 1, %s1803_s20  ;;  %s226_s9 = scalar_lea.vmem [#allocation3], %s1284_s21 }
  0x62   : > { %s2053_s3 = scalar_select %p151_p11, %s1803_s20, %s2772_s1  }
  0x63   : > { %s233_s26 = sshll.u32 %s226_s9, 4  ;;  %p2059_p4 = pnand %p1514_p7, %p2029_p3  ;;  %s2063_s26 = int_to_ptr.vmem [resolvable:$true] %s233_s26 }
  0x64   : > { %s2065_s17 = scalar_lea.sflag [#allocation4], %s222_s16  ;;  %s1679_s14 = scalar_lea.hbm %s2045_s5, 4096 }
  0x65   : > { %p1680_p5 = scmp.ne.s32.totalorder %s2045_s5, %s1679_s14  ;;  %p1681_p6 = pneg %p2059_p4 }
  0x66   : > { %s1684_s10 = scalar_lea.hbm %s2731_s0, 8192  ;;  %p1685_p12 = scmp.lt.u32.totalorder %s2045_s5, %s2731_s0 }
  0x67   : > { %p1682_p8 = pnand %p1681_p6, %p1680_p5  ;;  %p1686_p2 = scmp.lt.u32.totalorder %s1684_s10, %s1679_s14 }
  0x68   : > { %p1688_p1 = scmp.lt.u32.totalorder %s1679_s14, %s2045_s5 }
  0x69   : > { %p1683_p10 = pneg %p1682_p8  ;;  %p1687_p0 = por %p1686_p2, %p1685_p12 }
  0x6b   : > { %p1689_p3 = por %p1688_p1, %p1687_p0 }
  0x6d   : > { %p1690_p13 = pnand %p1689_p3, %p1683_p10 }
  0x6f   : > { %1693 = shalt.err (!%p1690_p13)
}
  0x70   : > { %s1694_s16 = scalar_lea.vmem %s2063_s26, 4096  ;;  %s1841_s12 = smov [#allocation3]  }
  0x71   : > { %p1695_p7 = scmp.ne.s32.totalorder %s2063_s26, %s1694_s16  ;;  %s1699_s15 = sshll.u32 %s1841_s12, 4  ;;  %s1700_s15 = int_to_ptr.vmem [resolvable:$false] %s1699_s15 }
  0x72   : > { %s1701_s13 = scalar_lea.vmem %s1700_s15, 8192  ;;  %p1702_p5 = scmp.lt.s32.totalorder %s2063_s26, %s1700_s15 }
  0x73   : > { %p1697_p9 = pnand %p1695_p7, %p1681_p6  ;;  %p1703_p8 = scmp.lt.s32.totalorder %s1701_s13, %s1694_s16 }
  0x75   : > { %p1698_p11 = pneg %p1697_p9  ;;  %p1704_p12 = por %p1703_p8, %p1702_p5 }
  0x77   : > { %p1705_p2 = pnand %p1704_p12, %p1698_p11 }
  0x79   : > { %1708 = shalt.err (!%p1705_p2)
}
  0x7a   : > { %s1842_s14 = smov 128   ;;  %s1843_s1 = smov 8  }
  0x7b   : > { %1507 = dma.hbm_to_vmem [thread:$0]  (!%p2059_p4), %s2045_s5, 4096, %s2063_s26, %s2065_s17, %s1842_s14, %s1842_s14, %s1843_s1  }
  0x7c   : > { %p2774_p6 = scmp.ne.s32.totalorder %s2766_s11, 0 }
  0x7e   : > { %245 = sbr.rel (%p2774_p6) target bundleno = 519 (0x207), region = 40 }
  0x85   : > { %s247_s9 = sand.u32 1, %s1811_s22   ;;  %p2775_p10 = scmp.ne.s32.totalorder %s2761_s8, 0 }
  0x86   : > { %s1288_s10 = sshll.u32 %s247_s9, 8  ;;  %s248_s21 = scalar_lea.sflag [#allocation4], %s247_s9 }
  0x87   : > { %s2096_s30 = scalar_lea.vmem [#allocation3], %s1288_s10 }
  0x88   : > { %1782 = dma.done.wait (%p2775_p10), %s248_s21, 4096  }
  0x89   : > { %1784 = vsyncadd (%p2775_p10), %s248_s21, 4294963200  ;;  %p2776_p0 = scmp.ne.s32.totalorder %s2760_s6, 0 }
  0x8b   : > { %1786 = dma.done.wait (%p2776_p0), [#allocation7], 1216  }
  0x8c   : > { %1788 = vsyncadd (%p2776_p0), [#allocation7], 4294966080  ;;  %s283_s26 = sand.u32 1, %s1799_s19   ;;  %p1292_p4 = scmp.ne.s32.totalorder %s1819_s24, 0 }
  0x8d   : > { %s1291_s11 = sshll.u32 %s283_s26, 7  ;;  %v346_v0 = vld [vmem:[%s2096_s30] sm:$0xff] (!%p1292_p4)  ;;  %v347_v1 = vld [vmem:[%s2096_s30 + $0x8] sm:$0xff] (!%p1292_p4)  ;;  %v348_v2 = vld [vmem:[%s2096_s30 + $0x10] sm:$0xff] (!%p1292_p4)  ;;  %v1844_v3 = vmov (!%p1292_p4), 0.0  }
  0x8e   : > { %s2109_s5 = scalar_lea.vmem [#allocation9], %s1291_s11  ;;  %291 = sbr.rel (%p1292_p4) target bundleno = 185 (0xb9), region = 56  ;;  %295 = vst [vmem:[#allocation2 + $0x18] sm:$0xff] (!%p1292_p4), %v1844_v3  ;;  %292 = vst [vmem:[#allocation2] sm:$0xff] (!%p1292_p4), %v1844_v3  ;;  %v349_v4 = vld [vmem:[%s2096_s30 + $0x18] sm:$0xff] (!%p1292_p4)  ;;  %v350_v5 = vld [vmem:[%s2096_s30 + $0x20] sm:$0xff] (!%p1292_p4) }
  0x8f   : > { %293 = vst [vmem:[#allocation2 + $0x8] sm:$0xff] (!%p1292_p4), %v1844_v3  ;;  %294 = vst [vmem:[#allocation2 + $0x10] sm:$0x3] (!%p1292_p4), %v1844_v3  ;;  %v351_v6 = vld [vmem:[%s2096_s30 + $0x28] sm:$0xff] (!%p1292_p4)  ;;  %v352_v7 = vld [vmem:[%s2096_s30 + $0x30] sm:$0xff] (!%p1292_p4) }
  0x90   : > { %296 = vst [vmem:[#allocation2 + $0x20] sm:$0xff] (!%p1292_p4), %v1844_v3  ;;  %297 = vst [vmem:[#allocation2 + $0x28] sm:$0x3] (!%p1292_p4), %v1844_v3  ;;  %v353_v8 = vld [vmem:[%s2096_s30 + $0x38] sm:$0xff] (!%p1292_p4)  ;;  %v354_v9 = vld [vmem:[%s2096_s30 + $0x40] sm:$0xff] (!%p1292_p4) }
  0x91   : > { %298 = vst [vmem:[#allocation2 + $0x30] sm:$0xff] (!%p1292_p4), %v1844_v3  ;;  %299 = vst [vmem:[#allocation2 + $0x38] sm:$0xff] (!%p1292_p4), %v1844_v3  ;;  %v355_v10 = vld [vmem:[%s2096_s30 + $0x48] sm:$0xff] (!%p1292_p4)  ;;  %v356_v11 = vld [vmem:[%s2096_s30 + $0x50] sm:$0xff] (!%p1292_p4) }
  0x92   : > { %300 = vst [vmem:[#allocation2 + $0x40] sm:$0x3] (!%p1292_p4), %v1844_v3  ;;  %301 = vst [vmem:[#allocation2 + $0x48] sm:$0xff] (!%p1292_p4), %v1844_v3  ;;  %v357_v12 = vld [vmem:[%s2096_s30 + $0x58] sm:$0xff] (!%p1292_p4)  ;;  %v358_v13 = vld [vmem:[%s2096_s30 + $0x60] sm:$0xff] (!%p1292_p4) }
  0x93   : > { %302 = vst [vmem:[#allocation2 + $0x50] sm:$0xff] (!%p1292_p4), %v1844_v3  ;;  %303 = vst [vmem:[#allocation2 + $0x58] sm:$0x3] (!%p1292_p4), %v1844_v3  ;;  %v359_v14 = vld [vmem:[%s2096_s30 + $0x68] sm:$0xff] (!%p1292_p4)  ;;  %v360_v15 = vld [vmem:[%s2096_s30 + $0x70] sm:$0xff] (!%p1292_p4) }
  0x94   : > { %304 = vst [vmem:[#allocation2 + $0x60] sm:$0xff] (!%p1292_p4), %v1844_v3  ;;  %305 = vst [vmem:[#allocation2 + $0x68] sm:$0xff] (!%p1292_p4), %v1844_v3  ;;  %v361_v16 = vld [vmem:[%s2096_s30 + $0x78] sm:$0xff] (!%p1292_p4)  ;;  %v362_v17 = vld [vmem:[%s2096_s30 + $0x80] sm:$0xff] (!%p1292_p4) }
  0x95   : > { %306 = vst [vmem:[#allocation2 + $0x70] sm:$0x3] %v1844_v3  ;;  %307 = vst [vmem:[#allocation2 + $0x78] sm:$0xff] %v1844_v3  ;;  %v363_v18 = vld [vmem:[%s2096_s30 + $0x88] sm:$0xff]  ;;  %v364_v19 = vld [vmem:[%s2096_s30 + $0x90] sm:$0xff] }
  0x96   : > { %308 = vst [vmem:[#allocation2 + $0x80] sm:$0xff] %v1844_v3  ;;  %309 = vst [vmem:[#allocation2 + $0x88] sm:$0x3] %v1844_v3  ;;  %v365_v20 = vld [vmem:[%s2096_s30 + $0x98] sm:$0xff]  ;;  %v366_v21 = vld [vmem:[%s2096_s30 + $0xa0] sm:$0xff] }
  0x97   : > { %310 = vst [vmem:[#allocation2 + $0x90] sm:$0xff] %v1844_v3  ;;  %311 = vst [vmem:[#allocation2 + $0x98] sm:$0xff] %v1844_v3  ;;  %v367_v22 = vld [vmem:[%s2096_s30 + $0xa8] sm:$0xff]  ;;  %v368_v23 = vld [vmem:[%s2096_s30 + $0xb0] sm:$0xff] }
  0x98   : > { %312 = vst [vmem:[#allocation2 + $0xa0] sm:$0x3] %v1844_v3  ;;  %313 = vst [vmem:[#allocation2 + $0xa8] sm:$0xff] %v1844_v3  ;;  %v369_v24 = vld [vmem:[%s2096_s30 + $0xb8] sm:$0xff]  ;;  %v370_v25 = vld [vmem:[%s2096_s30 + $0xc0] sm:$0xff] }
  0x99   : > { %314 = vst [vmem:[#allocation2 + $0xb0] sm:$0xff] %v1844_v3  ;;  %315 = vst [vmem:[#allocation2 + $0xb8] sm:$0x3] %v1844_v3  ;;  %v371_v26 = vld [vmem:[%s2096_s30 + $0xc8] sm:$0xff]  ;;  %v372_v27 = vld [vmem:[%s2096_s30 + $0xd0] sm:$0xff] }
  0x9a   : > { %316 = vst [vmem:[#allocation2 + $0xc0] sm:$0xff] %v1844_v3  ;;  %317 = vst [vmem:[#allocation2 + $0xc8] sm:$0xff] %v1844_v3  ;;  %v373_v28 = vld [vmem:[%s2096_s30 + $0xd8] sm:$0xff]  ;;  %v374_v29 = vld [vmem:[%s2096_s30 + $0xe0] sm:$0xff] }
  0x9b   : > { %318 = vst [vmem:[#allocation2 + $0xd0] sm:$0x3] %v1844_v3  ;;  %319 = vst [vmem:[#allocation2 + $0xd8] sm:$0xff] %v1844_v3  ;;  %v375_v30 = vld [vmem:[%s2096_s30 + $0xe8] sm:$0xff]  ;;  %v376_v31 = vld [vmem:[%s2096_s30 + $0xf0] sm:$0xff] }
  0x9c   : > { %320 = vst [vmem:[#allocation2 + $0xe0] sm:$0xff] %v1844_v3  ;;  %321 = vst [vmem:[#allocation2 + $0xe8] sm:$0x3] %v1844_v3  ;;  %v377_v32 = vld [vmem:[%s2096_s30 + $0xf8] sm:$0xff] }
  0x9d   : > { %322 = vst [vmem:[#allocation2 + $0xf0] sm:$0xff] %v1844_v3  ;;  %323 = vst [vmem:[#allocation2 + $0xf8] sm:$0xff] %v1844_v3 }
  0x9e   : > { %324 = vst [vmem:[#allocation2 + $0x100] sm:$0x3] %v1844_v3  ;;  %325 = vst [vmem:[#allocation2 + $0x108] sm:$0xff] %v1844_v3 }
  0x9f   : > { %326 = vst [vmem:[#allocation2 + $0x110] sm:$0xff] %v1844_v3  ;;  %327 = vst [vmem:[#allocation2 + $0x118] sm:$0x3] %v1844_v3 }
  0xa0   : > { %328 = vst [vmem:[#allocation2 + $0x120] sm:$0xff] %v1844_v3  ;;  %329 = vst [vmem:[#allocation2 + $0x128] sm:$0xff] %v1844_v3 }
  0xa1   : > { %330 = vst [vmem:[#allocation2 + $0x130] sm:$0x3] %v1844_v3  ;;  %331 = vst [vmem:[#allocation2 + $0x138] sm:$0xff] %v1844_v3 }
  0xa2   : > { %332 = vst [vmem:[#allocation2 + $0x140] sm:$0xff] %v1844_v3  ;;  %333 = vst [vmem:[#allocation2 + $0x148] sm:$0x3] %v1844_v3 }
  0xa3   : > { %334 = vst [vmem:[#allocation2 + $0x150] sm:$0xff] %v1844_v3  ;;  %335 = vst [vmem:[#allocation2 + $0x158] sm:$0xff] %v1844_v3 }
  0xa4   : > { %336 = vst [vmem:[#allocation2 + $0x160] sm:$0x3] %v1844_v3  ;;  %337 = vst [vmem:[#allocation2 + $0x168] sm:$0xff] %v1844_v3 }
  0xa5   : > { %338 = vst [vmem:[#allocation2 + $0x170] sm:$0xff] %v1844_v3  ;;  %339 = vst [vmem:[#allocation2 + $0x178] sm:$0x3] %v1844_v3 }
  0xa6   : > { %340 = vst [vmem:[#allocation2 + $0x180] sm:$0xff] %v1844_v3  ;;  %341 = vst [vmem:[#allocation2 + $0x188] sm:$0xff] %v1844_v3 }
  0xa7   : > { %342 = vst [vmem:[#allocation2 + $0x190] sm:$0x3] %v1844_v3  ;;  %343 = vst [vmem:[#allocation2 + $0x198] sm:$0xff] %v1844_v3 }
  0xa8   : > { %344 = vst [vmem:[#allocation2 + $0x1a0] sm:$0xff] %v1844_v3  ;;  %345 = vst [vmem:[#allocation2 + $0x1a8] sm:$0x3] %v1844_v3 }
  0xa9   : > { %379 = vst [vmem:[#allocation2 + $0x19] sm:$0xff] %v346_v0  ;;  %380 = vst [vmem:[#allocation2 + $0x21] sm:$0xff] %v347_v1 }
  0xaa   : > { %381 = vst [vmem:[#allocation2 + $0x31] sm:$0xff] %v348_v2  ;;  %382 = vst [vmem:[#allocation2 + $0x39] sm:$0xff] %v349_v4 }
  0xab   : > { %383 = vst [vmem:[#allocation2 + $0x49] sm:$0xff] %v350_v5  ;;  %384 = vst [vmem:[#allocation2 + $0x51] sm:$0xff] %v351_v6 }
  0xac   : > { %385 = vst [vmem:[#allocation2 + $0x61] sm:$0xff] %v352_v7  ;;  %386 = vst [vmem:[#allocation2 + $0x69] sm:$0xff] %v353_v8 }
  0xad   : > { %387 = vst [vmem:[#allocation2 + $0x79] sm:$0xff] %v354_v9  ;;  %388 = vst [vmem:[#allocation2 + $0x81] sm:$0xff] %v355_v10 }
  0xae   : > { %389 = vst [vmem:[#allocation2 + $0x91] sm:$0xff] %v356_v11  ;;  %390 = vst [vmem:[#allocation2 + $0x99] sm:$0xff] %v357_v12 }
  0xaf   : > { %391 = vst [vmem:[#allocation2 + $0xa9] sm:$0xff] %v358_v13  ;;  %392 = vst [vmem:[#allocation2 + $0xb1] sm:$0xff] %v359_v14 }
  0xb0   : > { %393 = vst [vmem:[#allocation2 + $0xc1] sm:$0xff] %v360_v15  ;;  %394 = vst [vmem:[#allocation2 + $0xc9] sm:$0xff] %v361_v16 }
  0xb1   : > { %395 = vst [vmem:[#allocation2 + $0xd9] sm:$0xff] %v362_v17  ;;  %396 = vst [vmem:[#allocation2 + $0xe1] sm:$0xff] %v363_v18 }
  0xb2   : > { %397 = vst [vmem:[#allocation2 + $0xf1] sm:$0xff] %v364_v19  ;;  %398 = vst [vmem:[#allocation2 + $0xf9] sm:$0xff] %v365_v20 }
  0xb3   : > { %399 = vst [vmem:[#allocation2 + $0x109] sm:$0xff] %v366_v21  ;;  %400 = vst [vmem:[#allocation2 + $0x111] sm:$0xff] %v367_v22 }
  0xb4   : > { %401 = vst [vmem:[#allocation2 + $0x121] sm:$0xff] %v368_v23  ;;  %402 = vst [vmem:[#allocation2 + $0x129] sm:$0xff] %v369_v24 }
  0xb5   : > { %403 = vst [vmem:[#allocation2 + $0x139] sm:$0xff] %v370_v25  ;;  %404 = vst [vmem:[#allocation2 + $0x141] sm:$0xff] %v371_v26 }
  0xb6   : > { %405 = vst [vmem:[#allocation2 + $0x151] sm:$0xff] %v372_v27  ;;  %406 = vst [vmem:[#allocation2 + $0x159] sm:$0xff] %v373_v28 }
  0xb7   : > { %407 = vst [vmem:[#allocation2 + $0x169] sm:$0xff] %v374_v29  ;;  %408 = vst [vmem:[#allocation2 + $0x171] sm:$0xff] %v375_v30 }
  0xb8   : > { %409 = vst [vmem:[#allocation2 + $0x181] sm:$0xff] %v376_v31  ;;  %410 = vst [vmem:[#allocation2 + $0x189] sm:$0xff] %v377_v32 }
  0xb9 PF: > { %v1615_v33 = vld [vmem:[#allocation8] sm:$0xff]   ;;  %v1616_v34 = vld [vmem:[#allocation8 + $0x8] sm:$0xff]   ;;  %s1294_s6 = smul.u32 192, %s1819_s24  ;;  %v1617_v35 = vld [vmem:[#allocation8 + $0x10] sm:$0xff]   ;;  %s1415_s15 = sshll.u32 %s1819_s24, 4 }
  0xba   : > { %1437 = vmatprep.subr.bf16.mxu0 %v1615_v33  ;;  %1469 = vmatprep.subr.bf16.mxu1 %v1615_v33  ;;  %v1618_v36 = vld [vmem:[#allocation8 + $0x18] sm:$0xff]   ;;  %v2149_v39 = vld [vmem:[#allocation6] ss:$0 sm:$0xff]  ;;  %v2155_v44 = vld [vmem:[#allocation6 + $0x1] ss:$0 sm:$0xff]  ;;  %s1416_s13 = sshll.u32 %s1823_s25, 5 }
  0xbb   : > { %1438 = vmatpush3.bf16.msra.mxu0 %v1615_v33  ;;  %1477 = vmatpush3.bf16.msra.mxu1 %v1615_v33  ;;  %s2145_s8 = scalar_lea.vmem [#allocation2], %s1294_s6  ;;  %v2157_v45 = vld [vmem:[#allocation8 + $0x20] sm:$0xff]   ;;  %v2163_v50 = vld [vmem:[#allocation6 + $0x2] ss:$0 sm:$0xff]  ;;  %v2169_v55 = vld [vmem:[#allocation6 + $0x4] ss:$0 sm:$0xff]  ;;  %s1159_s14 = sadd.s32 %s1416_s13, %s1415_s15 }
  0xbc   : > { %1439 = vmatprep.subr.bf16.mxu0 %v1616_v34  ;;  %1470 = vmatprep.subr.bf16.mxu1 %v1616_v34  ;;  %v2176_v61 = vld [vmem:[#allocation6 + $0x5] ss:$0 sm:$0xff]  ;;  %v2188_v3 = vld [vmem:[#allocation6 + $0x6] ss:$0 sm:$0xff]  ;;  %v1620_v5 = vld [vmem:[#allocation8 + $0x28] sm:$0xff]   ;;  %s1417_s1 = sshll.u32 %s1159_s14, 7 }
  0xbd   : > { %v2203_v12 = vld [vmem:[#allocation6 + $0x8] ss:$0 sm:$0xff]  ;;  %v2215_v17 = vld [vmem:[#allocation6 + $0x9] ss:$0 sm:$0xff]  ;;  %v2230_v24 = vld [vmem:[#allocation6 + $0xa] ss:$0 sm:$0xff] }
  0xbe   : > { %s1162_s24 = sshll.u32 %s2109_s5, 4  ;;  %s2789_s25 = sld [smem:[#allocation15_spill]]  ;;  %s2663_s24 = int_to_ptr.vmem [resolvable:$true] %s1162_s24 }
  0xbf   : > { %1440 = vmatpush3.bf16.msra.mxu0 %v1616_v34  ;;  %1478 = vmatpush3.bf16.msra.mxu1 %v1616_v34  ;;  %v414_v37 = vld [vmem:[%s2145_s8] sm:$0xff]  ;;  %v415_v38 = vld [vmem:[%s2145_s8 + $0x8] sm:$0xff]  ;;  %v1300_v53 = vld [vmem:[%s2145_s8 + $0x18] sm:$0xff]  ;;  %s2790_s21 = sld [smem:[#allocation26_spill]]  ;;  %s2670_s6 = scalar_lea.sflag [#allocation5], %s283_s26 }
  0xc0   : > { %1441 = vmatprep.subr.bf16.mxu0 %v1617_v35  ;;  %1471 = vmatprep.subr.bf16.mxu1 %v1617_v35  ;;  %v435_v40 = vmul.f32 %v2149_v39, %v414_v37  ;;  %v436_v41 = vmul.f32 %v2149_v39, %v415_v38  ;;  %v467_v42 = vld [vmem:[%s2145_s8 + $0x1] sm:$0xff]  ;;  %v468_v43 = vld [vmem:[%s2145_s8 + $0x9] sm:$0xff]  ;;  %v598_v58 = vmul.f32 %v2169_v55, %v1300_v53  ;;  %v1317_v59 = vld [vmem:[%s2145_s8 + $0x19] sm:$0xff]  ;;  %s1845_s29 = smov [#allocation9]  }
  0xc1   : > { %v488_v46 = vmul.f32 %v2155_v44, %v467_v42  ;;  %v489_v47 = vmul.f32 %v2155_v44, %v468_v43  ;;  %v520_v48 = vld [vmem:[%s2145_s8 + $0x2] sm:$0xff]  ;;  %v521_v49 = vld [vmem:[%s2145_s8 + $0xa] sm:$0xff]  ;;  %v651_v63 = vmul.f32 %v2176_v61, %v1317_v59  ;;  %v2183_v1 = vld [vmem:[%s2145_s8 + $0x1a] sm:$0xff]  ;;  %v2191_v4 = vmul.f32 %v1300_v53, %v2149_v39  ;;  %s1713_s17 = sshll.u32 %s1845_s29, 4  ;;  %s1714_s17 = int_to_ptr.vmem [resolvable:$false] %s1713_s17 }
  0xc2   : > { %v541_v51 = vmul.f32 %v2163_v50, %v520_v48  ;;  %v542_v52 = vmul.f32 %v2163_v50, %v521_v49  ;;  %v1301_v54 = vld [vmem:[%s2145_s8 + $0x20] sm:$0xff]  ;;  %v704_v8 = vmul.f32 %v2188_v3, %v2183_v1  ;;  %v2198_v10 = vld [vmem:[%s2145_s8 + $0x30] sm:$0xff]  ;;  %v2201_v11 = vld [vmem:[%s2145_s8 + $0x38] sm:$0xff]  ;;  %v2245_v30 = vmul.f32 %v1317_v59, %v2155_v44  ;;  %s1715_s16 = scalar_lea.vmem %s1714_s17, 4096  ;;  %p1716_p9 = scmp.lt.s32.totalorder %s2663_s24, %s1714_s17 }
  0xc3   : > { %1442 = vmatpush3.bf16.msra.mxu0 %v1617_v35  ;;  %1479 = vmatpush3.bf16.msra.mxu1 %v1617_v35  ;;  %v504_v56 = vadd.f32 %v488_v46, %v435_v40  ;;  %v505_v57 = vadd.f32 %v489_v47, %v436_v41  ;;  %v2174_v60 = vld [vmem:[%s2145_s8 + $0x21] sm:$0xff]  ;;  %v599_v62 = vmul.f32 %v2169_v55, %v1301_v54  ;;  %v2210_v15 = vld [vmem:[%s2145_s8 + $0x31] sm:$0xff]  ;;  %v2213_v16 = vld [vmem:[%s2145_s8 + $0x39] sm:$0xff] }
  0xc4   : > { %1443 = vmatprep.subr.bf16.mxu0 %v1618_v36  ;;  %1472 = vmatprep.subr.bf16.mxu1 %v1618_v36  ;;  %v652_v0 = vmul.f32 %v2176_v61, %v2174_v60  ;;  %v2186_v2 = vld [vmem:[%s2145_s8 + $0x22] sm:$0xff]  ;;  %v761_v13 = vmul.f32 %v2203_v12, %v2198_v10  ;;  %v762_v14 = vmul.f32 %v2203_v12, %v2201_v11  ;;  %v2225_v22 = vld [vmem:[%s2145_s8 + $0x32] sm:$0xff]  ;;  %v2228_v23 = vld [vmem:[%s2145_s8 + $0x3a] sm:$0xff]  ;;  %p2792_p3 = scmp.ne.s32.totalorder %s2789_s25, 0 }
  0xc5   : > { %v557_v6 = vadd.f32 %v541_v51, %v504_v56  ;;  %v558_v7 = vadd.f32 %v542_v52, %v505_v57  ;;  %v705_v9 = vmul.f32 %v2188_v3, %v2186_v2  ;;  %v2218_v18 = vmul.f32 %v1301_v54, %v2149_v39  ;;  %v2239_v28 = vld [vmem:[%s2145_s8 + $0x60] sm:$0xff]  ;;  %v2242_v29 = vld [vmem:[%s2145_s8 + $0x68] sm:$0xff]  ;;  %v2274_v48 = vld [vmem:[%s2145_s8 + $0x78] sm:$0xff]  ;;  %s2791_s30 = smov %s2790_s21  ;;  %s2661_s11 = scalar_lea.hbm %s2790_s21, %s1417_s1 }
  0xc6   : > { %v814_v21 = vmul.f32 %v2215_v17, %v2210_v15  ;;  %v815_v25 = vmul.f32 %v2215_v17, %v2213_v16  ;;  %v867_v26 = vmul.f32 %v2230_v24, %v2225_v22  ;;  %v868_v27 = vmul.f32 %v2230_v24, %v2228_v23  ;;  %v2252_v35 = vld [vmem:[%s2145_s8 + $0x61] sm:$0xff]  ;;  %v2267_v41 = vld [vmem:[%s2145_s8 + $0x6a] sm:$0xff]  ;;  %2777 = vst [vmem:[#allocation18_spill] sm:$0xff] %v2274_v48  ;;  %v2284_v56 = vld [vmem:[%s2145_s8 + $0x79] sm:$0xff] }
  0xc7   : > { %1444 = vmatpush3.bf16.msra.mxu0 %v1618_v36  ;;  %1480 = vmatpush3.bf16.msra.mxu1 %v1618_v36  ;;  %v614_v19 = vadd.f32 %v598_v58, %v557_v6  ;;  %v615_v20 = vadd.f32 %v599_v62, %v558_v7  ;;  %v443_v33 = vmul.f32 %v2149_v39, %v2239_v28  ;;  %v2255_v36 = vld [vmem:[%s2145_s8 + $0x69] sm:$0xff]  ;;  %v2277_v49 = vld [vmem:[%s2145_s8 + $0x80] sm:$0xff] }
  0xc8   : > { %1445 = vmatprep.subr.bf16.mxu0 %v2157_v45  ;;  %1473 = vmatprep.subr.bf16.mxu1 %v2157_v45  ;;  %v444_v34 = vmul.f32 %v2149_v39, %v2242_v29  ;;  %v2258_v37 = vld [vmem:[%s2145_s8 + $0x62] sm:$0xff]  ;;  %v496_v38 = vmul.f32 %v2155_v44, %v2252_v35  ;;  %v497_v40 = vmul.f32 %v2155_v44, %v2255_v36  ;;  %v1621_v43 = vld [vmem:[#allocation8 + $0x30] sm:$0xff]  }
  0xc9   : > { %v667_v31 = vadd.f32 %v651_v63, %v614_v19  ;;  %v668_v32 = vadd.f32 %v652_v0, %v615_v20  ;;  %v549_v42 = vmul.f32 %v2163_v50, %v2258_v37  ;;  %2778 = vst [vmem:[#allocation19_spill] sm:$0xff] %v2277_v49  ;;  %v606_v53 = vmul.f32 %v2169_v55, %v2274_v48  ;;  %v2287_v57 = vld [vmem:[%s2145_s8 + $0x81] sm:$0xff] }
  0xca   : > { %v512_v51 = vadd.f32 %v496_v38, %v443_v33  ;;  %v513_v52 = vadd.f32 %v497_v40, %v444_v34  ;;  %v607_v54 = vmul.f32 %v2169_v55, %v2277_v49  ;;  %2779 = vst [vmem:[#allocation20_spill] sm:$0xff] %v2284_v56  ;;  %2780 = vst [vmem:[#allocation21_spill] sm:$0xff] %v2287_v57  ;;  %v2294_v0 = vld [vmem:[%s2145_s8 + $0x7a] sm:$0xff]  ;;  %v2319_v38 = vld [vmem:[%s2145_s8 + $0x91] sm:$0xff] }
  0xcb   : > { %1446 = vmatpush3.bf16.msra.mxu0 %v2157_v45  ;;  %1481 = vmatpush3.bf16.msra.mxu1 %v2157_v45  ;;  %v720_v46 = vadd.f32 %v704_v8, %v667_v31  ;;  %v721_v47 = vadd.f32 %v705_v9, %v668_v32  ;;  %v550_v45 = vmul.f32 %v2163_v50, %v2267_v41  ;;  %v2297_v8 = vld [vmem:[%s2145_s8 + $0x82] sm:$0xff]  ;;  %v2304_v31 = vld [vmem:[%s2145_s8 + $0x90] sm:$0xff]  ;;  %v2312_v32 = vld [vmem:[%s2733_s2] ss:$0 sm:$0xff] }
  0xcc   : > { %1447 = vmatprep.subr.bf16.mxu0 %v1620_v5  ;;  %1474 = vmatprep.subr.bf16.mxu1 %v1620_v5  ;;  %v659_v62 = vmul.f32 %v2176_v61, %v2284_v56  ;;  %v660_v63 = vmul.f32 %v2176_v61, %v2287_v57  ;;  %2781 = vst [vmem:[#allocation22_spill] sm:$0xff] %v2294_v0  ;;  %2782 = vst [vmem:[#allocation23_spill] sm:$0xff] %v2297_v8  ;;  %v2322_v40 = vld [vmem:[%s2145_s8 + $0x99] sm:$0xff] }
  0xcd   : > { %v777_v58 = vadd.f32 %v761_v13, %v720_v46  ;;  %v778_v59 = vadd.f32 %v762_v14, %v721_v47  ;;  %v565_v6 = vadd.f32 %v549_v42, %v512_v51  ;;  %v566_v7 = vadd.f32 %v550_v45, %v513_v52  ;;  %v1622_v13 = vld [vmem:[#allocation8 + $0x38] sm:$0xff]  }
  0xce   : > { %v712_v9 = vmul.f32 %v2188_v3, %v2294_v0  ;;  %v713_v20 = vmul.f32 %v2188_v3, %v2297_v8  ;;  %v822_v47 = vmul.f32 %v2215_v17, %v2319_v38  ;;  %v823_v45 = vmul.f32 %v2215_v17, %v2322_v40  ;;  %v2329_v51 = vld [vmem:[%s2145_s8 + $0x92] sm:$0xff] }
  0xcf   : > { %1448 = vmatpush3.bf16.msra.mxu0 %v1620_v5  ;;  %1482 = vmatpush3.bf16.msra.mxu1 %v1620_v5  ;;  %v830_v14 = vadd.f32 %v814_v21, %v777_v58  ;;  %v831_v19 = vadd.f32 %v815_v25, %v778_v59  ;;  %v2307_v5 = vld [vmem:[%s2145_s8 + $0x98] sm:$0xff]  ;;  %v622_v33 = vadd.f32 %v606_v53, %v565_v6 }
  0xd0   : > { %1449 = vmatprep.subr.bf16.mxu0 %v1621_v43  ;;  %1475 = vmatprep.subr.bf16.mxu1 %v1621_v43  ;;  %v623_v34 = vadd.f32 %v607_v54, %v566_v7  ;;  %v769_v21 = vmul.f32 %v2203_v12, %v2304_v31  ;;  %v770_v25 = vmul.f32 %v2203_v12, %v2307_v5  ;;  %v2332_v54 = vld [vmem:[%s2145_s8 + $0x9a] sm:$0xff] }
  0xd1   : > { %v883_v42 = vadd.f32 %v867_v26, %v830_v14  ;;  %v884_v46 = vadd.f32 %v868_v27, %v831_v19  ;;  %v675_v52 = vadd.f32 %v659_v62, %v622_v33  ;;  %v875_v58 = vmul.f32 %v2230_v24, %v2329_v51 }
  0xd2   : > { %v676_v53 = vadd.f32 %v660_v63, %v623_v34  ;;  %v876_v59 = vmul.f32 %v2230_v24, %v2332_v54  ;;  %v506_v62 = vadd.f32 %v2245_v30, %v2191_v4  ;;  %v543_v19 = vmul.f32 %v2183_v1, %v2163_v50 }
  0xd3   : > { %1450 = vmatpush3.bf16.msra.mxu0 %v1621_v43  ;;  %1483 = vmatpush3.bf16.msra.mxu1 %v1621_v43  ;;  %v906_v26 = vadd.f32 %v2312_v32, %v883_v42  ;;  %v907_v27 = vadd.f32 %v2312_v32, %v884_v46  ;;  %v728_v6 = vadd.f32 %v712_v9, %v675_v52 }
  0xd4   : > { %1451 = vmatprep.subr.bf16.mxu0 %v1622_v13  ;;  %1476 = vmatprep.subr.bf16.mxu1 %v1622_v13  ;;  %v729_v7 = vadd.f32 %v713_v20, %v676_v53  ;;  %v491_v43 = vmul.f32 %v2174_v60, %v2155_v44  ;;  %v544_v33 = vmul.f32 %v2186_v2, %v2163_v50  ;;  %v2362_v53 = vld [vmem:[%s2145_s8 + $0x48] sm:$0xff] }
  0xd5   : > { %v922_v63 = vmax.f32 %v906_v26, 0.0  ;;  %v923_v14 = vmax.f32 %v907_v27, 0.0  ;;  %v785_v34 = vadd.f32 %v769_v21, %v728_v6  ;;  %v559_v60 = vadd.f32 %v543_v19, %v506_v62  ;;  %v2365_v27 = vld [vmem:[%s2145_s8 + $0x50] sm:$0xff] }
  0xd6   : > { %v786_v9 = vadd.f32 %v770_v25, %v729_v7  ;;  %v507_v20 = vadd.f32 %v491_v43, %v2218_v18  ;;  %v600_v4 = vmul.f32 %v2198_v10, %v2169_v55  ;;  %v601_v30 = vmul.f32 %v2201_v11, %v2169_v55  ;;  %v2370_v7 = vld [vmem:[%s2145_s8 + $0x49] sm:$0xff]  ;;  %v2373_v43 = vld [vmem:[%s2145_s8 + $0x51] sm:$0xff] }
  0xd7   : > { %1452 = vmatpush3.bf16.msra.mxu0 %v1622_v13  ;;  %1484 = vmatpush3.bf16.msra.mxu1 %v1622_v13  ;;  %v938_v42 = vpack.c.bf16 %v923_v14, %v922_v63  ;;  %v838_v1 = vadd.f32 %v822_v47, %v785_v34  ;;  %v653_v13 = vmul.f32 %v2210_v15, %v2176_v61 }
  0xd8   : > { %v839_v2 = vadd.f32 %v823_v45, %v786_v9  ;;  %v560_v46 = vadd.f32 %v544_v33, %v507_v20  ;;  %v616_v21 = vadd.f32 %v600_v4, %v559_v60  ;;  %v654_v18 = vmul.f32 %v2213_v16, %v2176_v61  ;;  %v2387_v9 = vld [vmem:[%s2145_s8 + $0x52] sm:$0xff] }
  0xd9   : > { %1453 = vmatprep.mubr.bf16.mxu0 %v938_v42  ;;  %v706_v25 = vmul.f32 %v2225_v22, %v2188_v3  ;;  %v707_v52 = vmul.f32 %v2228_v23, %v2188_v3  ;;  %v891_v47 = vadd.f32 %v875_v58, %v838_v1  ;;  %v763_v6 = vmul.f32 %v2203_v12, %v2362_v53 }
  0xda   : > { %v892_v45 = vadd.f32 %v876_v59, %v839_v2  ;;  %v617_v26 = vadd.f32 %v601_v30, %v560_v46  ;;  %v669_v62 = vadd.f32 %v653_v13, %v616_v21  ;;  %v764_v63 = vmul.f32 %v2203_v12, %v2365_v27  ;;  %v2382_v59 = vld [vmem:[%s2145_s8 + $0x4a] sm:$0xff] }
  0xdb   : > { %v816_v14 = vmul.f32 %v2215_v17, %v2370_v7  ;;  %v817_v58 = vmul.f32 %v2215_v17, %v2373_v43  ;;  %v914_v19 = vadd.f32 %v2312_v32, %v891_v47  ;;  %v869_v20 = vmul.f32 %v2230_v24, %v2382_v59 }
  0xdc   : > { %v915_v33 = vadd.f32 %v2312_v32, %v892_v45  ;;  %v670_v34 = vadd.f32 %v654_v18, %v617_v26  ;;  %v722_v42 = vadd.f32 %v706_v25, %v669_v62  ;;  %v870_v60 = vmul.f32 %v2230_v24, %v2387_v9 }
  0xdd   : > { %v445_v4 = vmul.f32 %v2274_v48, %v2149_v39  ;;  %v446_v30 = vmul.f32 %v2277_v49, %v2149_v39  ;;  %v930_v1 = vmax.f32 %v914_v19, 0.0  ;;  %v498_v13 = vmul.f32 %v2284_v56, %v2155_v44 }
  0xde   : > { %v931_v2 = vmax.f32 %v915_v33, 0.0  ;;  %v723_v46 = vadd.f32 %v707_v52, %v670_v34  ;;  %v779_v21 = vadd.f32 %v763_v6, %v722_v42  ;;  %v499_v18 = vmul.f32 %v2287_v57, %v2155_v44 }
  0xdf   : > { %v551_v25 = vmul.f32 %v2294_v0, %v2163_v50  ;;  %v552_v47 = vmul.f32 %v2297_v8, %v2163_v50  ;;  %v514_v62 = vadd.f32 %v498_v13, %v445_v4  ;;  %v608_v52 = vmul.f32 %v2304_v31, %v2169_v55  ;;  %v2421_v13 = vld [vmem:[%s2145_s8 + $0xb0] sm:$0xff] }
  0xe0   : > { %v942_v45 = vpack.c.bf16 %v931_v2, %v930_v1  ;;  %v780_v26 = vadd.f32 %v764_v63, %v723_v46  ;;  %v832_v19 = vadd.f32 %v816_v14, %v779_v21  ;;  %v515_v6 = vadd.f32 %v499_v18, %v446_v30  ;;  %v2416_v2 = vld [vmem:[%s2145_s8 + $0xa8] sm:$0xff]  ;;  %v2442_v8 = vld [vmem:[%s2145_s8 + $0xb2] sm:$0xff] }
  0xe1   : > { %v609_v33 = vmul.f32 %v2307_v5, %v2169_v55  ;;  %v661_v34 = vmul.f32 %v2319_v38, %v2176_v61  ;;  %v567_v1 = vadd.f32 %v551_v25, %v514_v62  ;;  %v662_v63 = vmul.f32 %v2322_v40, %v2176_v61  ;;  %v2426_v21 = vld [vmem:[%s2145_s8 + $0xa9] sm:$0xff] }
  0xe2   : > { %1461 = vmatprep.mubr.bf16.mxu1 %v942_v45  ;;  %v833_v42 = vadd.f32 %v817_v58, %v780_v26  ;;  %v714_v4 = vmul.f32 %v2329_v51, %v2188_v3  ;;  %v885_v14 = vadd.f32 %v869_v20, %v832_v19  ;;  %v568_v30 = vadd.f32 %v552_v47, %v515_v6  ;;  %v2431_v26 = vld [vmem:[%s2145_s8 + $0xb1] sm:$0xff] }
  0xe3   : > { %v715_v46 = vmul.f32 %v2332_v54, %v2188_v3  ;;  %v771_v58 = vmul.f32 %v2203_v12, %v2416_v2  ;;  %v624_v25 = vadd.f32 %v608_v52, %v567_v1  ;;  %v772_v45 = vmul.f32 %v2203_v12, %v2421_v13  ;;  %v2436_v47 = vld [vmem:[%s2145_s8 + $0xaa] sm:$0xff] }
  0xe4   : > { %v886_v18 = vadd.f32 %v870_v60, %v833_v42  ;;  %v824_v20 = vmul.f32 %v2215_v17, %v2426_v21  ;;  %v908_v62 = vadd.f32 %v2312_v32, %v885_v14  ;;  %v625_v19 = vadd.f32 %v609_v33, %v568_v30 }
  0xe5   : > { %v825_v6 = vmul.f32 %v2215_v17, %v2431_v26  ;;  %v877_v60 = vmul.f32 %v2230_v24, %v2436_v47  ;;  %v677_v42 = vadd.f32 %v661_v34, %v624_v25  ;;  %v878_v1 = vmul.f32 %v2230_v24, %v2442_v8 }
  0xe6   : > { %v909_v52 = vadd.f32 %v2312_v32, %v886_v18  ;;  %v439_v0 = vmul.f32 %v2198_v10, %v2149_v39  ;;  %v924_v57 = vmax.f32 %v908_v62, 0.0  ;;  %v678_v14 = vadd.f32 %v662_v63, %v625_v19 }
  0xe7   : > { %v440_v33 = vmul.f32 %v2201_v11, %v2149_v39  ;;  %v492_v30 = vmul.f32 %v2210_v15, %v2155_v44  ;;  %v730_v49 = vadd.f32 %v714_v4, %v677_v42  ;;  %v493_v18 = vmul.f32 %v2213_v16, %v2155_v44 }
  0xe8   : > { %v925_v56 = vmax.f32 %v909_v52, 0.0  ;;  %v545_v34 = vmul.f32 %v2225_v22, %v2163_v50  ;;  %v731_v25 = vadd.f32 %v715_v46, %v678_v14  ;;  %v546_v10 = vmul.f32 %v2228_v23, %v2163_v50 }
  0xe9   : > { %v508_v48 = vadd.f32 %v492_v30, %v439_v0  ;;  %v602_v63 = vmul.f32 %v2362_v53, %v2169_v55  ;;  %v787_v62 = vadd.f32 %v771_v58, %v730_v49  ;;  %v509_v19 = vadd.f32 %v493_v18, %v440_v33 }
  0xea   : > { %v939_v11 = vpack.c.bf16 %v925_v56, %v924_v57  ;;  %v603_v15 = vmul.f32 %v2365_v27, %v2169_v55  ;;  %v788_v4 = vadd.f32 %v772_v45, %v731_v25  ;;  %v655_v16 = vmul.f32 %v2370_v7, %v2176_v61 }
  0xeb   : > { %v561_v52 = vadd.f32 %v545_v34, %v508_v48  ;;  %v656_v22 = vmul.f32 %v2373_v43, %v2176_v61  ;;  %v840_v0 = vadd.f32 %v824_v20, %v787_v62  ;;  %v562_v23 = vadd.f32 %v546_v10, %v509_v19 }
  0xec   : > { %1454 = vmatmul.mubr.bf16.vlgmr.msra.gmra.mrb[0].mxu0 %v939_v11  ;;  %v708_v46 = vmul.f32 %v2382_v59, %v2188_v3  ;;  %v709_v49 = vmul.f32 %v2387_v9, %v2188_v3  ;;  %v841_v56 = vadd.f32 %v825_v6, %v788_v4  ;;  %v765_v48 = vmul.f32 %v2203_v12, %v2239_v28 }
  0xed   : > { %v618_v57 = vadd.f32 %v602_v63, %v561_v52  ;;  %v766_v58 = vmul.f32 %v2203_v12, %v2242_v29  ;;  %v893_v45 = vadd.f32 %v877_v60, %v840_v0  ;;  %v619_v42 = vadd.f32 %v603_v15, %v562_v23 }
  0xee   : > { %v818_v20 = vmul.f32 %v2215_v17, %v2252_v35  ;;  %v819_v14 = vmul.f32 %v2215_v17, %v2255_v36  ;;  %v894_v33 = vadd.f32 %v878_v1, %v841_v56  ;;  %v871_v6 = vmul.f32 %v2230_v24, %v2258_v37 }
  0xef   : > { %v671_v30 = vadd.f32 %v655_v16, %v618_v57  ;;  %v872_v18 = vmul.f32 %v2230_v24, %v2267_v41  ;;  %v916_v34 = vadd.f32 %v2312_v32, %v893_v45  ;;  %v672_v25 = vadd.f32 %v656_v22, %v619_v42  ;;  %v2512_v45 = vld [vmem:[%s2145_s8 + $0xc0] sm:$0xff] }
  0xf0   : > { %v447_v60 = vmul.f32 %v2304_v31, %v2149_v39  ;;  %v448_v10 = vmul.f32 %v2307_v5, %v2149_v39  ;;  %v917_v63 = vadd.f32 %v2312_v32, %v894_v33  ;;  %v500_v1 = vmul.f32 %v2319_v38, %v2155_v44 }
  0xf1   : > { %v724_v11 = vadd.f32 %v708_v46, %v671_v30  ;;  %v501_v62 = vmul.f32 %v2322_v40, %v2155_v44  ;;  %v932_v19 = vmax.f32 %v916_v34, 0.0  ;;  %v725_v15 = vadd.f32 %v709_v49, %v672_v25  ;;  %v2515_v30 = vld [vmem:[%s2145_s8 + $0xc8] sm:$0xff] }
  0xf2   : > { %v553_v4 = vmul.f32 %v2329_v51, %v2163_v50  ;;  %v554_v31 = vmul.f32 %v2332_v54, %v2163_v50  ;;  %v933_v52 = vmax.f32 %v917_v63, 0.0  ;;  %v516_v16 = vadd.f32 %v500_v1, %v447_v60  ;;  %v2520_v34 = vld [vmem:[%s2145_s8 + $0xc1] sm:$0xff]  ;;  %v2523_v25 = vld [vmem:[%s2145_s8 + $0xc9] sm:$0xff] }
  0xf3   : > { %v781_v5 = vadd.f32 %v765_v48, %v724_v11  ;;  %v517_v22 = vadd.f32 %v501_v62, %v448_v10  ;;  %v782_v0 = vadd.f32 %v766_v58, %v725_v15  ;;  %v610_v38 = vmul.f32 %v2416_v2, %v2169_v55  ;;  %v2532_v11 = vld [vmem:[%s2145_s8 + $0xc2] sm:$0xff]  ;;  %v2536_v15 = vld [vmem:[%s2145_s8 + $0xca] sm:$0xff] }
  0xf4   : > { %v611_v40 = vmul.f32 %v2421_v13, %v2169_v55  ;;  %v663_v23 = vmul.f32 %v2426_v21, %v2176_v61  ;;  %v943_v51 = vpack.c.bf16 %v933_v52, %v932_v19  ;;  %v569_v46 = vadd.f32 %v553_v4, %v516_v16 }
  0xf5   : > { %v834_v54 = vadd.f32 %v818_v20, %v781_v5  ;;  %v570_v49 = vadd.f32 %v554_v31, %v517_v22  ;;  %v835_v56 = vadd.f32 %v819_v14, %v782_v0  ;;  %v664_v57 = vmul.f32 %v2431_v26, %v2176_v61 }
  0xf6   : > { %v716_v48 = vmul.f32 %v2436_v47, %v2188_v3  ;;  %v717_v58 = vmul.f32 %v2442_v8, %v2188_v3  ;;  %1462 = vmatmul.mubr.bf16.vlgmr.msra.gmra.mrb[0].mxu1 %v943_v51  ;;  %v626_v33 = vadd.f32 %v610_v38, %v569_v46  ;;  %v773_v14 = vmul.f32 %v2203_v12, %v2512_v45 }
  0xf7   : > { %v887_v42 = vadd.f32 %v871_v6, %v834_v54  ;;  %v627_v20 = vadd.f32 %v611_v40, %v570_v49  ;;  %v888_v60 = vadd.f32 %v872_v18, %v835_v56  ;;  %v774_v10 = vmul.f32 %v2203_v12, %v2515_v30 }
  0xf8   : > { %v826_v63 = vmul.f32 %v2215_v17, %v2520_v34  ;;  %v827_v6 = vmul.f32 %v2215_v17, %v2523_v25  ;;  %v679_v62 = vadd.f32 %v663_v23, %v626_v33  ;;  %v879_v18 = vmul.f32 %v2230_v24, %v2532_v11 }
  0xf9   : > { %v910_v1 = vadd.f32 %v2312_v32, %v887_v42  ;;  %v680_v19 = vadd.f32 %v664_v57, %v627_v20  ;;  %v911_v4 = vadd.f32 %v2312_v32, %v888_v60  ;;  %v880_v31 = vmul.f32 %v2230_v24, %v2536_v15  ;;  %v2783_v20 = vld [vmem:[#allocation18_spill] sm:$0xff] }
  0xfa   : > { %v441_v52 = vmul.f32 %v2362_v53, %v2149_v39  ;;  %v442_v5 = vmul.f32 %v2365_v27, %v2149_v39  ;;  %v732_v22 = vadd.f32 %v716_v48, %v679_v62  ;;  %v494_v38 = vmul.f32 %v2370_v7, %v2155_v44  ;;  %v2786_v62 = vld [vmem:[#allocation21_spill] sm:$0xff] }
  0xfb   : > { %v926_v16 = vmax.f32 %v910_v1, 0.0  ;;  %v733_v0 = vadd.f32 %v717_v58, %v680_v19  ;;  %v927_v40 = vmax.f32 %v911_v4, 0.0  ;;  %v495_v23 = vmul.f32 %v2373_v43, %v2155_v44  ;;  %v2785_v1 = vld [vmem:[#allocation20_spill] sm:$0xff] }
  0xfc   : > { %v547_v51 = vmul.f32 %v2382_v59, %v2163_v50  ;;  %v548_v54 = vmul.f32 %v2387_v9, %v2163_v50  ;;  %v789_v53 = vadd.f32 %v773_v14, %v732_v22  ;;  %v510_v49 = vadd.f32 %v494_v38, %v441_v52 }
  0xfd   : > { %v790_v46 = vadd.f32 %v774_v10, %v733_v0  ;;  %v604_v27 = vmul.f32 %v2169_v55, %v2239_v28  ;;  %v940_v56 = vpack.c.bf16 %v927_v40, %v926_v16  ;;  %v511_v57 = vadd.f32 %v495_v23, %v442_v5  ;;  %v2784_v10 = vld [vmem:[#allocation19_spill] sm:$0xff] }
  0xfe   : > { %v605_v7 = vmul.f32 %v2169_v55, %v2242_v29  ;;  %v657_v43 = vmul.f32 %v2176_v61, %v2252_v35  ;;  %v842_v48 = vadd.f32 %v826_v63, %v789_v53  ;;  %v563_v59 = vadd.f32 %v547_v51, %v510_v49 }
  0xff   : > { %v843_v58 = vadd.f32 %v827_v6, %v790_v46  ;;  %v658_v9 = vmul.f32 %v2176_v61, %v2255_v36  ;;  %1457 = vmatprep.mubr.bf16.mxu0 %v940_v56  ;;  %v564_v42 = vadd.f32 %v548_v54, %v511_v57  ;;  %v710_v33 = vmul.f32 %v2188_v3, %v2258_v37  ;;  %v2787_v37 = vld [vmem:[#allocation22_spill] sm:$0xff] }
 0x100   : > { %v711_v28 = vmul.f32 %v2188_v3, %v2267_v41  ;;  %v767_v29 = vmul.f32 %v2203_v12, %v2783_v20  ;;  %v895_v14 = vadd.f32 %v879_v18, %v842_v48  ;;  %v620_v35 = vadd.f32 %v604_v27, %v563_v59  ;;  %v1384_v59 = vld [vmem:[%s2145_s8 + $0xd9] sm:$0xff] }
 0x101   : > { %v896_v60 = vadd.f32 %v880_v31, %v843_v58  ;;  %v768_v63 = vmul.f32 %v2203_v12, %v2784_v10  ;;  %v621_v6 = vadd.f32 %v605_v7, %v564_v42  ;;  %v820_v36 = vmul.f32 %v2215_v17, %v2785_v1  ;;  %v2788_v31 = vld [vmem:[#allocation23_spill] sm:$0xff]  ;;  %v1367_v7 = vld [vmem:[%s2145_s8 + $0xd8] sm:$0xff] }
 0x102   : > { %v821_v19 = vmul.f32 %v2215_v17, %v2786_v62  ;;  %v873_v4 = vmul.f32 %v2230_v24, %v2787_v37  ;;  %v918_v41 = vadd.f32 %v2312_v32, %v895_v14  ;;  %v673_v18 = vadd.f32 %v657_v43, %v620_v35  ;;  %v1368_v58 = vld [vmem:[%s2145_s8 + $0xe0] sm:$0xff] }
 0x103   : > { %v919_v52 = vadd.f32 %v2312_v32, %v896_v60  ;;  %v874_v5 = vmul.f32 %v2230_v24, %v2788_v31  ;;  %v674_v16 = vadd.f32 %v658_v9, %v621_v6  ;;  %v449_v22 = vmul.f32 %v2416_v2, %v2149_v39  ;;  %v1402_v35 = vld [vmem:[%s2145_s8 + $0xe2] sm:$0xff] }
 0x104   : > { %v450_v0 = vmul.f32 %v2421_v13, %v2149_v39  ;;  %v502_v38 = vmul.f32 %v2426_v21, %v2155_v44  ;;  %v934_v40 = vmax.f32 %v918_v41, 0.0  ;;  %v726_v51 = vadd.f32 %v710_v33, %v673_v18 }
 0x105   : > { %v935_v23 = vmax.f32 %v919_v52, 0.0  ;;  %v503_v54 = vmul.f32 %v2431_v26, %v2155_v44  ;;  %v727_v53 = vadd.f32 %v711_v28, %v674_v16  ;;  %v555_v49 = vmul.f32 %v2436_v47, %v2163_v50 }
 0x106   : > { %v518_v46 = vadd.f32 %v502_v38, %v449_v22  ;;  %v556_v2 = vmul.f32 %v2442_v8, %v2163_v50  ;;  %v783_v39 = vadd.f32 %v767_v29, %v726_v51  ;;  %v612_v21 = vmul.f32 %v2512_v45, %v2169_v55  ;;  %v1401_v29 = vld [vmem:[%s2145_s8 + $0xda] sm:$0xff] }
 0x107   : > { %v944_v27 = vpack.c.bf16 %v935_v23, %v934_v40  ;;  %v519_v13 = vadd.f32 %v503_v54, %v450_v0  ;;  %v784_v56 = vadd.f32 %v768_v63, %v727_v53  ;;  %v613_v44 = vmul.f32 %v2515_v30, %v2169_v55 }
 0x108   : > { %v571_v57 = vadd.f32 %v555_v49, %v518_v46  ;;  %v665_v26 = vmul.f32 %v2520_v34, %v2176_v61  ;;  %v836_v47 = vadd.f32 %v820_v36, %v783_v39  ;;  %v666_v8 = vmul.f32 %v2523_v25, %v2176_v61  ;;  %v1385_v61 = vld [vmem:[%s2145_s8 + $0xe1] sm:$0xff]  ;;  %s1709_s8 = scalar_lea.vmem %s2663_s24, 2048 }
 0x109   : > { %1465 = vmatprep.mubr.bf16.mxu1 %v944_v27  ;;  %v572_v50 = vadd.f32 %v556_v2, %v519_v13  ;;  %v837_v43 = vadd.f32 %v821_v19, %v784_v56  ;;  %v718_v48 = vmul.f32 %v2532_v11, %v2188_v3  ;;  %v719_v34 = vmul.f32 %v2536_v15, %v2188_v3  ;;  %p1710_p1 = scmp.ne.s32.totalorder %s2663_s24, %s1709_s8  ;;  %p1717_p11 = scmp.lt.s32.totalorder %s1715_s16, %s1709_s8 }
 0x10a   : > { %v628_v45 = vadd.f32 %v612_v21, %v571_v57  ;;  %v889_v55 = vadd.f32 %v873_v4, %v836_v47  ;;  %v775_v33 = vmul.f32 %v2203_v12, %v1367_v7  ;;  %v776_v20 = vmul.f32 %v2203_v12, %v1368_v58 }
 0x10b   : > { %v629_v30 = vadd.f32 %v613_v44, %v572_v50  ;;  %v890_v9 = vadd.f32 %v874_v5, %v837_v43  ;;  %v828_v60 = vmul.f32 %v2215_v17, %v1384_v59  ;;  %v829_v15 = vmul.f32 %v2215_v17, %v1385_v61  ;;  %p1711_p13 = pnand %p1710_p1, %p2792_p3  ;;  %p1718_p5 = por %p1717_p11, %p1716_p9 }
 0x10c   : > { %v681_v42 = vadd.f32 %v665_v26, %v628_v45  ;;  %v912_v25 = vadd.f32 %v2312_v32, %v889_v55  ;;  %v881_v1 = vmul.f32 %v2230_v24, %v1401_v29  ;;  %v882_v62 = vmul.f32 %v2230_v24, %v1402_v35  ;;  %v2624_v24 = vld [vmem:[%s2735_s4] ss:$0 sm:$0xff] }
 0x10d   : > { %v682_v28 = vadd.f32 %v666_v8, %v629_v30  ;;  %v913_v11 = vadd.f32 %v2312_v32, %v890_v9  ;;  %p1712_p7 = pneg %p1711_p13 }
 0x10e   : > { %v734_v14 = vadd.f32 %v718_v48, %v681_v42  ;;  %v928_v10 = vmax.f32 %v912_v25, 0.0 }
 0x10f   : > { %v735_v3 = vadd.f32 %v719_v34, %v682_v28  ;;  %v929_v63 = vmax.f32 %v913_v11, 0.0  ;;  %p1719_p8 = pnand %p1718_p5, %p1712_p7 }
 0x110   : > { %v791_v6 = vadd.f32 %v775_v33, %v734_v14 }
 0x111   : > { %v792_v36 = vadd.f32 %v776_v20, %v735_v3  ;;  %v941_v19 = vpack.c.bf16 %v929_v63, %v928_v10 }
 0x112   : > { %v844_v12 = vadd.f32 %v828_v60, %v791_v6 }
 0x113   : > { %v845_v37 = vadd.f32 %v829_v15, %v792_v36  ;;  %1458 = vmatmul.mubr.bf16.gmra.mrb[4].mxu0 %v941_v19 }
 0x114   : > { %v897_v4 = vadd.f32 %v881_v1, %v844_v12 }
 0x115   : > { %v898_v41 = vadd.f32 %v882_v62, %v845_v37 }
 0x116   : > { %v920_v52 = vadd.f32 %v2312_v32, %v897_v4 }
 0x117   : > { %v921_v18 = vadd.f32 %v2312_v32, %v898_v41 }
 0x118   : > { %v936_v31 = vmax.f32 %v920_v52, 0.0 }
 0x119   : > { %v937_v17 = vmax.f32 %v921_v18, 0.0 }
 0x11b   : > { %v945_v5 = vpack.c.bf16 %v937_v17, %v936_v31 }
 0x11d   : > { %1466 = vmatmul.mubr.bf16.gmra.mrb[4].mxu1 %v945_v5 }
 0x1bf   : > { %v1455_v16 = vpop.f32.mrb[0].mxu0 }
 0x1c0   : > { %v1060_v22 = vadd.f32 %v1455_v16, %v2624_v24  ;;  %v1051_v0 = vpop.f32.mrb[1].mxu0 }
 0x1c1   : > { %v1052_v38 = vadd.f32 %v2624_v24, %v1051_v0  ;;  %v1456_v32 = vpop.f32.mrb[2].mxu0 }
 0x1c2   : > { %v1116_v40 = vmax.f32 %v1060_v22, 0.0  ;;  %v1063_v23 = vadd.f32 %v1456_v32, %v2624_v24  ;;  %v1054_v51 = vpop.f32.mrb[3].mxu0 }
 0x1c3   : > { %v1114_v54 = vmax.f32 %v1052_v38, 0.0  ;;  %v1055_v53 = vadd.f32 %v2624_v24, %v1054_v51 }
 0x1c4   : > { %1132 = vst [vmem:[%s2109_s5 + $0x10] sm:$0xff] %v1116_v40  ;;  %v1117_v46 = vmax.f32 %v1063_v23, 0.0 }
 0x1c5   : > { %1130 = vst [vmem:[%s2109_s5] sm:$0xff] %v1114_v54  ;;  %v1115_v49 = vmax.f32 %v1055_v53, 0.0 }
 0x1c6   : > { %1133 = vst [vmem:[%s2109_s5 + $0x18] sm:$0xff] %v1117_v46 }
 0x1c7   : > { %1131 = vst [vmem:[%s2109_s5 + $0x8] sm:$0xff] %v1115_v49 }
 0x1c9   : > { %v1463_v2 = vpop.f32.mrb[0].mxu1 }
 0x1ca   : > { %v1092_v27 = vadd.f32 %v1463_v2, %v2624_v24  ;;  %v1083_v39 = vpop.f32.mrb[1].mxu1 }
 0x1cb   : > { %v1084_v13 = vadd.f32 %v2624_v24, %v1083_v39  ;;  %v1464_v21 = vpop.f32.mrb[2].mxu1 }
 0x1cc   : > { %v1124_v56 = vmax.f32 %v1092_v27, 0.0  ;;  %v1095_v57 = vadd.f32 %v1464_v21, %v2624_v24  ;;  %v1086_v44 = vpop.f32.mrb[3].mxu1 }
 0x1cd   : > { %v1122_v26 = vmax.f32 %v1084_v13, 0.0  ;;  %v1087_v47 = vadd.f32 %v2624_v24, %v1086_v44 }
 0x1ce   : > { %1140 = vst [vmem:[%s2109_s5 + $0x50] sm:$0xff] %v1124_v56  ;;  %v1125_v50 = vmax.f32 %v1095_v57, 0.0 }
 0x1cf   : > { %1138 = vst [vmem:[%s2109_s5 + $0x40] sm:$0xff] %v1122_v26  ;;  %v1123_v8 = vmax.f32 %v1087_v47, 0.0 }
 0x1d0   : > { %1141 = vst [vmem:[%s2109_s5 + $0x58] sm:$0xff] %v1125_v50 }
 0x1d1   : > { %1139 = vst [vmem:[%s2109_s5 + $0x48] sm:$0xff] %v1123_v8 }
 0x1e6   : > { %v1459_v7 = vpop.f32.mrb[4].mxu0 }
 0x1e7   : > { %v1076_v43 = vadd.f32 %v1459_v7, %v2624_v24  ;;  %v1067_v45 = vpop.f32.mrb[5].mxu0 }
 0x1e8   : > { %v1068_v48 = vadd.f32 %v2624_v24, %v1067_v45  ;;  %v1460_v58 = vpop.f32.mrb[6].mxu0 }
 0x1e9   : > { %v1120_v55 = vmax.f32 %v1076_v43, 0.0  ;;  %v1079_v30 = vadd.f32 %v1460_v58, %v2624_v24  ;;  %v1070_v34 = vpop.f32.mrb[7].mxu0 }
 0x1ea   : > { %v1118_v59 = vmax.f32 %v1068_v48, 0.0  ;;  %v1071_v9 = vadd.f32 %v2624_v24, %v1070_v34 }
 0x1eb   : > { %1136 = vst [vmem:[%s2109_s5 + $0x30] sm:$0xff] %v1120_v55  ;;  %v1121_v42 = vmax.f32 %v1079_v30, 0.0 }
 0x1ec   : > { %1134 = vst [vmem:[%s2109_s5 + $0x20] sm:$0xff] %v1118_v59  ;;  %v1119_v33 = vmax.f32 %v1071_v9, 0.0 }
 0x1ed   : > { %1137 = vst [vmem:[%s2109_s5 + $0x38] sm:$0xff] %v1121_v42 }
 0x1ee   : > { %1135 = vst [vmem:[%s2109_s5 + $0x28] sm:$0xff] %v1119_v33 }
 0x1f0   : > { %v1467_v61 = vpop.f32.mrb[4].mxu1 }
 0x1f1   : > { %v1108_v25 = vadd.f32 %v1467_v61, %v2624_v24  ;;  %v1099_v28 = vpop.f32.mrb[5].mxu1 }
 0x1f2   : > { %v1100_v20 = vadd.f32 %v2624_v24, %v1099_v28  ;;  %v1468_v29 = vpop.f32.mrb[6].mxu1 }
 0x1f3   : > { %v1128_v11 = vmax.f32 %v1108_v25, 0.0  ;;  %v1111_v14 = vadd.f32 %v1468_v29, %v2624_v24  ;;  %v1102_v60 = vpop.f32.mrb[7].mxu1 }
 0x1f4   : > { %v1126_v35 = vmax.f32 %v1100_v20, 0.0  ;;  %v1103_v10 = vadd.f32 %v2624_v24, %v1102_v60 }
 0x1f5   : > { %1144 = vst [vmem:[%s2109_s5 + $0x70] sm:$0xff] %v1128_v11  ;;  %v1129_v3 = vmax.f32 %v1111_v14, 0.0 }
 0x1f6   : > { %1142 = vst [vmem:[%s2109_s5 + $0x60] sm:$0xff] %v1126_v35  ;;  %v1127_v15 = vmax.f32 %v1103_v10, 0.0 }
 0x1f7   : > { %1145 = vst [vmem:[%s2109_s5 + $0x78] sm:$0xff] %v1129_v3 }
 0x1f8   : > { %1143 = vst [vmem:[%s2109_s5 + $0x68] sm:$0xff] %v1127_v15 }
 0x1f9   : > { %1722 = shalt.err (!%p1719_p8)
}
 0x1fa   : > { %s1723_s26 = scalar_lea.hbm %s2661_s11, 2048  ;;  %s1727_s15 = scalar_lea.hbm %s2791_s30, 8192 }
 0x1fb   : > { %p1724_p12 = scmp.ne.s32.totalorder %s2661_s11, %s1723_s26  ;;  %p1728_p10 = scmp.lt.u32.totalorder %s2661_s11, %s2791_s30 }
 0x1fc   : > { %p1729_p0 = scmp.lt.u32.totalorder %s1727_s15, %s1723_s26  ;;  %p1731_p1 = scmp.lt.u32.totalorder %s1723_s26, %s2661_s11 }
 0x1fd   : > { %p1725_p2 = pnand %p1724_p12, %p2792_p3 }
 0x1fe   : > { %p1730_p4 = por %p1729_p0, %p1728_p10 }
 0x1ff   : > { %p1726_p6 = pneg %p1725_p2 }
 0x200   : > { %p1732_p13 = por %p1731_p1, %p1730_p4 }
 0x202   : > { %p1733_p7 = pnand %p1732_p13, %p1726_p6 }
 0x204   : > { %1736 = shalt.err (!%p1733_p7)
}
 0x205   : > { %s1846_s1 = smov 128   ;;  %s1847_s9 = smov 8  }
 0x206   : > { %1495 = dma.vmem_to_hbm [thread:$0]  (%p2792_p3), %s2663_s24, 2048, %s2661_s11, %s2670_s6, %s1846_s1, %s1846_s1, %s1847_s9  }
 0x207 PF: > { %s2793_s10 = sld [smem:[#allocation13_spill]]  ;;  %s2794_s21 = sld [smem:[#allocation16_spill]] }
 0x208   : > { %p1517_p9 = scmp.ge.s32.totalorder %s1835_s28, 2 }
 0x20d   : > { %s1177_s8 = sand.u32 1, %s2793_s10   ;;  %p2795_p11 = scmp.ne.s32.totalorder %s2794_s21, 0 }
 0x20e   : > { %s1178_s29 = scalar_lea.sflag [#allocation5], %s1177_s8 }
 0x20f   : > { %p1509_p5 = pnand %p1517_p9, %p2795_p11 }
 0x211   : > { %1790 = dma.done.wait (!%p1509_p5), %s1178_s29, 2048  }
 0x212   : > { %1792 = vsyncadd (!%p1509_p5), %s1178_s29, 4294965248  ;;  %s22_s28 = sadd.s32 1, %s1835_s28   ;;  %s2796_s24 = smov %s2048_s18 }
 0x213   : > { %p19_p8 = scmp.ge.s32.totalorder %s22_s28, 6   ;;  %s2797_s25 = sld [smem:[#allocation14_spill]] }
 0x214   : > { %s2798_s26 = sld [smem:[#allocation17_spill]]  ;;  %s2799_s18 = smov %s1799_s19 }
 0x215   : > { %s2800_s19 = smov %s1803_s20  ;;  %s2801_s20 = smov %s2053_s3 }
 0x216   : > { %s2802_s21 = smov %s1811_s22  ;;  %s2803_s22 = smov %s1815_s23 }
 0x217   : > { %s2804_s23 = smov %s2796_s24  ;;  %21 = sbr.rel (!%p19_p8) target bundleno = 14 (0xe), region = 103 }
 0x219   : > { %s2805_s24 = smov %s2797_s25  ;;  %s2806_s25 = smov %s1831_s27 }
 0x21a   : > { %s2807_s27 = smov %s2813_s7 }
 0x21e   :  { %1183 = vsyncpa [#allocation4], 1 }
 0x21f   :  { %1185 = vsyncpa [#allocation4 + $0x1], 1 }
 0x220   :  { %1186 = vsyncpa [#allocation7], 1 }
 0x221   :  { %1187 = vsyncpa [#allocation5], 1 }
 0x222   :  { %1189 = vsyncpa [#allocation5 + $0x1], 1 }

</bundles_post_ra>
